<compile_context>
chip_gen: v6e
topology: v6e:2x2x1
jax: 0.10.0
libtpu: 0.0.40
codegen_flags: <defaults>
</compile_context>

<pallas_src>
import jax
import jax.numpy as jnp
from jax.experimental import pallas as pl
from jax.experimental.pallas import tpu as pltpu

# ----------------------------- model constants ------------------------------
B, H, W = 2, 16, 16          # batch, spatial
PATCH = 8                    # encoder.patch_size
GH, GW = H // PATCH, W // PATCH
N_PATCH = GH * GW            # tokens per image (without cls)
D_MODEL = 32                 # hidden size
D_MLP = 64                   # MLP hidden
N_COLORS = 128               # number_of_colors (ab color bins, Q)
SIGMA_AB = 5.0               # gaussian sigma for SoftEncodeAB surrogate
T_DECODE = 0.38              # AnnealedMeanDecodeQuery special_T
REBAL_LAMBDA = 0.5           # class_rebal_lambda


# ------------------------------ Pallas kernels -------------------------------
def _fused_encdec_kernel(patches_ref, pos_ref,
                         wpe_ref, bpe_ref,
                         w1_ref, b1_ref, w2_ref, b2_ref,
                         wf_ref, bfeat_ref, wc_ref, bc_ref,
                         centers_ref,
                         logits_ref, feat_ref, ab_ref):
    """Fused ViT-surrogate encoder + linear decoder + annealed-mean decode.

    All per-patch rows in one VMEM-resident block; matmuls use bf16 operands
    with f32 accumulation on the MXU.  The cls token never mixes with patch
    tokens in this attention-free surrogate block and is stripped afterwards
    anyway ('vit' extra-token path), so its rows are elided entirely.
    """
    f32 = jnp.float32
    bf16 = jnp.bfloat16

    # ---- patch embedding + positional embedding ----
    patches = patches_ref[...].astype(bf16)                       # [T, 3*P*P]
    x = (jnp.dot(patches, wpe_ref[...], preferred_element_type=f32)
         + bpe_ref[...] + pos_ref[...])                           # [T, D]

    # ---- pre-LN MLP block with residual (surrogate transformer block) ----
    mu = jnp.mean(x, axis=-1, keepdims=True)
    xc = x - mu
    var = jnp.mean(xc * xc, axis=-1, keepdims=True)
    xn = xc * jax.lax.rsqrt(var + 1e-6)
    h = jnp.dot(xn.astype(bf16), w1_ref[...],
                preferred_element_type=f32) + b1_ref[...]         # [T, D_MLP]
    h = jax.nn.gelu(h, approximate=True)
    x = x + jnp.dot(h.astype(bf16), w2_ref[...],
                    preferred_element_type=f32) + b2_ref[...]     # [T, D]

    # ---- decoder surrogate: per-patch features + color-bin logits ----
    feat = jnp.dot(x.astype(bf16), wf_ref[...],
                   preferred_element_type=f32) + bfeat_ref[...]   # [T, D]
    logits = jnp.dot(feat.astype(bf16), wc_ref[...],
                     preferred_element_type=f32) + bc_ref[...]    # [T, Q]
    feat_ref[...] = feat
    logits_ref[...] = logits

    # ---- AnnealedMeanDecodeQuery at patch granularity ----
    # softmax(log_softmax(q)/T) == softmax(q/T); expectation over bin centers.
    scaled = logits * (1.0 / T_DECODE)
    m = jnp.max(scaled, axis=-1, keepdims=True)
    e = jnp.exp(scaled - m)
    p = e * pl.reciprocal(jnp.sum(e, axis=-1, keepdims=True), approx=True)
    ab_ref[...] = jnp.dot(p, centers_ref[...], preferred_element_type=f32)


def _soft_encode_kernel(ab_ref, ca_ref, cb_ref, o_ref):
    """SoftEncodeAB surrogate: gaussian soft assignment of each (a,b) pixel to
    the Q gamut bin centers, computed with VPU broadcast-subtract-square
    (no degenerate K=2 MXU matmul, no cancellation in d2).

    TODO(synk): original CT2 uses 5-nearest-neighbour gaussian weights; here a
    full gaussian over all bins is used (same normalization / argmax)."""
    ab = ab_ref[...]                                   # [T, 2]
    a = ab[:, 0:1]                                     # [T, 1]
    b = ab[:, 1:2]                                     # [T, 1]
    da = a - ca_ref[...]                               # [T, Q]
    db = b - cb_ref[...]                               # [T, Q]
    d2 = da * da + db * db
    z = jnp.exp(d2 * (-1.0 / (2.0 * SIGMA_AB * SIGMA_AB)))
    o_ref[...] = z * pl.reciprocal(jnp.sum(z, axis=-1, keepdims=True),
                                   approx=True)


# ------------------------------ kernel wrappers -------------------------------
def _full_block(shape):
    # single-block spec (block == full array; grid=(1,))
    return pl.BlockSpec(shape, lambda i: (0,) * len(shape))


def fused_encoder_decoder(patches, pos_patch, params, ab_centers):
    """patches: [T, 3*P*P]; returns (logits [T,Q], feat [T,D], ab [T,2])."""
    T = patches.shape[0]
    bf16 = jnp.bfloat16
    inputs = [
        patches,
        pos_patch,
        params['patch_w'].astype(bf16),
        params['patch_b'].reshape(1, D_MODEL),
        params['mlp_w1'].astype(bf16),
        params['mlp_b1'].reshape(1, D_MLP),
        params['mlp_w2'].astype(bf16),
        params['mlp_b2'].reshape(1, D_MODEL),
        params['dec_feat_w'].astype(bf16),
        params['dec_feat_b'].reshape(1, D_MODEL),
        params['dec_cls_w'].astype(bf16),
        params['dec_cls_b'].reshape(1, N_COLORS),
        ab_centers,
    ]
    out_shape = (jax.ShapeDtypeStruct((T, N_COLORS), jnp.float32),
                 jax.ShapeDtypeStruct((T, D_MODEL), jnp.float32),
                 jax.ShapeDtypeStruct((T, 2), jnp.float32))
    out_specs = (_full_block((T, N_COLORS)),
                 _full_block((T, D_MODEL)),
                 _full_block((T, 2)))
    # NOTE(v7x): at real image sizes use a "parallel" patch-row grid axis so
    # the work shards across the 2 TensorCores; at T=8 a single block is right.
    return pl.pallas_call(
        _fused_encdec_kernel,
        out_shape=out_shape,
        grid=(1,),
        in_specs=[_full_block(a.shape) for a in inputs],
        out_specs=out_specs,
        compiler_params=pltpu.CompilerParams(
            dimension_semantics=("arbitrary",)),
    )(*inputs)


def soft_encode(ab_pix, ab_centers):
    """ab_pix: [npix, 2] -> soft one-hot over Q bins, [npix, Q]."""
    npix = ab_pix.shape[0]
    ca = ab_centers[:, 0].reshape(1, N_COLORS)
    cb = ab_centers[:, 1].reshape(1, N_COLORS)
    # Single block: npix=512 rows x 128 bins f32 = 256 KiB, trivially in VMEM;
    # avoids per-128-row grid-step overhead.  Re-tile if scaled to real images.
    return pl.pallas_call(
        _soft_encode_kernel,
        out_shape=jax.ShapeDtypeStruct((npix, N_COLORS), jnp.float32),
        grid=(1,),
        in_specs=[_full_block((npix, 2)),
                  _full_block((1, N_COLORS)),
                  _full_block((1, N_COLORS))],
        out_specs=_full_block((npix, N_COLORS)),
        compiler_params=pltpu.CompilerParams(
            dimension_semantics=("arbitrary",)),
    )(ab_pix, ca, cb)


# ------------------------------ parameter init -------------------------------
def init_params(key):
    ks = jax.random.split(key, 8)

    def w(k, shape, scale=0.02):
        return jax.random.normal(k, shape, jnp.float32) * scale

    return dict(
        patch_w=w(ks[0], (3 * PATCH * PATCH, D_MODEL)),
        patch_b=jnp.zeros((D_MODEL,), jnp.float32),
        cls_token=w(ks[1], (1, 1, D_MODEL)),        # kept for fidelity; unused
        pos_embed=w(ks[2], (1, N_PATCH + 1, D_MODEL)),
        mlp_w1=w(ks[3], (D_MODEL, D_MLP)),
        mlp_b1=jnp.zeros((D_MLP,), jnp.float32),
        mlp_w2=w(ks[4], (D_MLP, D_MODEL)),
        mlp_b2=jnp.zeros((D_MODEL,), jnp.float32),
        dec_feat_w=w(ks[5], (D_MODEL, D_MODEL)),
        dec_feat_b=jnp.zeros((D_MODEL,), jnp.float32),
        dec_cls_w=w(ks[6], (D_MODEL, N_COLORS)),
        dec_cls_b=jnp.zeros((N_COLORS,), jnp.float32),
    )


def make_cielab():
    """Deterministic surrogate of CIELAB gamut: bin centers + empirical prior."""
    q = jnp.arange(N_COLORS, dtype=jnp.float32)
    centers_a = (q % 16.0) * 13.0 - 97.5
    centers_b = jnp.floor(q / 16.0) * 25.0 - 87.5
    ab_centers = jnp.stack([centers_a, centers_b], axis=1)      # [Q, 2]
    prior = 1.0 + (jnp.arange(N_COLORS) % 7).astype(jnp.float32)
    prior = prior / jnp.sum(prior)
    return ab_centers, prior


def make_class_weights(prior, lam=REBAL_LAMBDA):
    """Mirror of GetClassWeights.__init__ (host-side, init-time)."""
    n_pos = jnp.sum(prior > 0).astype(jnp.float32)
    uniform = jnp.where(prior > 0, 1.0 / n_pos, 0.0)
    weights = 1.0 / ((1.0 - lam) * prior + lam * uniform)
    weights = weights / jnp.sum(prior * weights)
    return weights                                              # [Q]


# -------------------------------- forward pass -------------------------------
@jax.jit
def segmenter_forward(luminance, ground_truth_ab, params, ab_centers,
                      class_weights):
    # ---- normalize_luminance + repeat(1, 3, 1, 1) ----
    image = (luminance - 50.0) / 100.0
    image = jnp.repeat(image, 3, axis=1)                        # [B, 3, H, W]

    # ---- patchify for the encoder surrogate ----
    patches = image.reshape(B, 3, GH, PATCH, GW, PATCH)
    patches = patches.transpose(0, 2, 4, 1, 3, 5).reshape(
        B * N_PATCH, 3 * PATCH * PATCH)
    # positional embedding of the patch tokens (cls row: attention-free
    # surrogate block never mixes tokens and 'vit' strips the extra token,
    # so its rows are elided from the fused kernel — outputs are identical).
    pos_patch = jnp.broadcast_to(params['pos_embed'][:, 1:, :],
                                 (B, N_PATCH, D_MODEL)).reshape(
        B * N_PATCH, D_MODEL)

    # ---- fused encoder + decoder + AnnealedMeanDecodeQuery (patch level) ----
    patch_logits, out_feat_flat, ab_patch = fused_encoder_decoder(
        patches, pos_patch, params, ab_centers)
    out_feat = out_feat_flat.reshape(B, N_PATCH, D_MODEL)

    # masks: pure spatial broadcast of per-patch logits to pixels -> [B,Q,H,W]
    logits_g = patch_logits.reshape(B, GH, GW, N_COLORS)
    masks = jnp.broadcast_to(
        logits_g[:, :, None, :, None, :],
        (B, GH, PATCH, GW, PATCH, N_COLORS)).reshape(B, H, W, N_COLORS)
    query_prediction = masks.transpose(0, 3, 1, 2)              # [B, Q, H, W]

    # ---- classification branch (not without_classification) ----
    # query_actual = self.encode_ab(ground_truth_ab)
    npix = B * H * W
    ab_pix = ground_truth_ab.transpose(0, 2, 3, 1).reshape(npix, 2)
    query_actual_pix = soft_encode(ab_pix, ab_centers)          # [npix, Q]
    query_actual = query_actual_pix.reshape(B, H, W, N_COLORS).transpose(
        0, 3, 1, 2)                                             # [B, Q, H, W]

    # color_weights / rebalance_loss: RebalanceLoss.forward is identity and
    # the class-rebalance weights only rescale gradients in backward.
    # TODO(synk): gradient rescaling (custom_vjp) not implemented; the
    # GetClassWeights argmax lookup is therefore elided in this forward-only
    # port (class_weights is kept in the API but unused here).
    del class_weights

    # ab_prediction = self.decode_query(query_prediction): decoded at patch
    # granularity inside the fused kernel (all pixels of a patch share the
    # same logits, so values are identical), then broadcast to pixels.
    ab_g = ab_patch.reshape(B, GH, GW, 2)
    ab_prediction = jnp.broadcast_to(
        ab_g[:, :, None, :, None, :],
        (B, GH, PATCH, GW, PATCH, 2)).reshape(B, H, W, 2).transpose(0, 3, 1, 2)

    return ab_prediction, query_prediction, query_actual, out_feat


# ------------------------------------ main ------------------------------------
if __name__ == "__main__":
    key = jax.random.PRNGKey(0)
    k_lum, k_ab, k_par = jax.random.split(key, 3)

    luminance = jax.random.uniform(k_lum, (B, 1, H, W), jnp.float32,
                                   minval=0.0, maxval=100.0)
    ground_truth_ab = jax.random.uniform(k_ab, (B, 2, H, W), jnp.float32,
                                         minval=-100.0, maxval=100.0)
    params = init_params(k_par)
    ab_centers, prior = make_cielab()
    class_weights = make_class_weights(prior)

    outs = segmenter_forward(luminance, ground_truth_ab, params, ab_centers,
                             class_weights)
    for o in outs:
        jax.block_until_ready(o)

    ab_prediction, query_prediction, query_actual, out_feat = outs
    assert ab_prediction.shape == (B, 2, H, W)
    assert query_prediction.shape == (B, N_COLORS, H, W)
    assert query_actual.shape == (B, N_COLORS, H, W)
    assert out_feat.shape == (B, N_PATCH, D_MODEL)
    print("KERNEL_OK")
</pallas_src>

<mosaic_0001>
module attributes {stable_mosaic.version = 11 : i64} {
  func.func @_soft_encode_kernel(%arg0: i32, %arg1: memref<512x2xf32, #tpu.memory_space<vmem>>, %arg2: memref<1x128xf32, #tpu.memory_space<vmem>>, %arg3: memref<1x128xf32, #tpu.memory_space<vmem>>, %arg4: memref<512x128xf32, #tpu.memory_space<vmem>>) attributes {dimension_semantics = [#tpu.dimension_semantics<arbitrary>], iteration_bounds = array<i64: 1>, scalar_prefetch = 0 : i64, scratch_operands = 0 : i64, tpu.core_type = #tpu.core_type<tc>, window_params = [{pipeline_mode = #tpu.pipeline_mode<synchronous>, transform_indices = @transform_0, window_bounds = array<i64: 512, 2>}, {pipeline_mode = #tpu.pipeline_mode<synchronous>, transform_indices = @transform_1, window_bounds = array<i64: 1, 128>}, {pipeline_mode = #tpu.pipeline_mode<synchronous>, transform_indices = @transform_2, window_bounds = array<i64: 1, 128>}, {pipeline_mode = #tpu.pipeline_mode<synchronous>, transform_indices = @transform_3, window_bounds = array<i64: 512, 128>}]} {
    %c0 = arith.constant 0 : index
    %c0_0 = arith.constant 0 : index
    %0 = vector.load %arg1[%c0, %c0_0] : memref<512x2xf32, #tpu.memory_space<vmem>>, vector<512x2xf32>
    %1 = vector.extract_strided_slice %0 {offsets = [0, 0], sizes = [512, 1], strides = [1, 1]} : vector<512x2xf32> to vector<512x1xf32>
    %2 = vector.extract_strided_slice %0 {offsets = [0, 1], sizes = [512, 1], strides = [1, 1]} : vector<512x2xf32> to vector<512x1xf32>
    %c0_1 = arith.constant 0 : index
    %c0_2 = arith.constant 0 : index
    %3 = vector.load %arg2[%c0_1, %c0_2] : memref<1x128xf32, #tpu.memory_space<vmem>>, vector<1x128xf32>
    %4 = vector.broadcast %1 : vector<512x1xf32> to vector<512x128xf32>
    %5 = vector.broadcast %3 : vector<1x128xf32> to vector<512x128xf32>
    %6 = arith.subf %4, %5 : vector<512x128xf32>
    %c0_3 = arith.constant 0 : index
    %c0_4 = arith.constant 0 : index
    %7 = vector.load %arg3[%c0_3, %c0_4] : memref<1x128xf32, #tpu.memory_space<vmem>>, vector<1x128xf32>
    %8 = vector.broadcast %2 : vector<512x1xf32> to vector<512x128xf32>
    %9 = vector.broadcast %7 : vector<1x128xf32> to vector<512x128xf32>
    %10 = arith.subf %8, %9 : vector<512x128xf32>
    %11 = arith.mulf %6, %6 : vector<512x128xf32>
    %12 = arith.mulf %10, %10 : vector<512x128xf32>
    %13 = arith.addf %11, %12 : vector<512x128xf32>
    %cst = arith.constant -2.000000e-02 : f32
    %14 = vector.broadcast %cst : f32 to vector<512x128xf32>
    %15 = arith.mulf %13, %14 : vector<512x128xf32>
    %16 = math.exp %15 : vector<512x128xf32>
    %cst_5 = arith.constant dense<0.000000e+00> : vector<512xf32>
    %17 = vector.multi_reduction <add>, %16, %cst_5 [1] : vector<512x128xf32> to vector<512xf32>
    %18 = vector.shape_cast %17 : vector<512xf32> to vector<512x1xf32>
    %19 = tpu.reciprocal %18 {approx = true} : vector<512x1xf32> -> vector<512x1xf32>
    %20 = vector.broadcast %19 : vector<512x1xf32> to vector<512x128xf32>
    %21 = arith.mulf %16, %20 : vector<512x128xf32>
    %c0_6 = arith.constant 0 : index
    %c0_7 = arith.constant 0 : index
    %22 = vector.load %arg4[%c0_6, %c0_7] : memref<512x128xf32, #tpu.memory_space<vmem>>, vector<512x128xf32>
    tpu.vector_store %arg4[%c0_6, %c0_7], %21 {strides = array<i32>} : memref<512x128xf32, #tpu.memory_space<vmem>>, vector<512x128xf32>,
    return
  }
  func.func @transform_0(%arg0: i32) -> (i32, i32) {
    %c0_i32 = arith.constant 0 : i32
    %c0_i32_0 = arith.constant 0 : i32
    %c0_i32_1 = arith.constant 0 : i32
    return %c0_i32, %c0_i32_0 : i32, i32
  }
  func.func @transform_1(%arg0: i32) -> (i32, i32) {
    %c0_i32 = arith.constant 0 : i32
    %c0_i32_0 = arith.constant 0 : i32
    %c0_i32_1 = arith.constant 0 : i32
    return %c0_i32, %c0_i32_0 : i32, i32
  }
  func.func @transform_2(%arg0: i32) -> (i32, i32) {
    %c0_i32 = arith.constant 0 : i32
    %c0_i32_0 = arith.constant 0 : i32
    %c0_i32_1 = arith.constant 0 : i32
    return %c0_i32, %c0_i32_0 : i32, i32
  }
  func.func @transform_3(%arg0: i32) -> (i32, i32) {
    %c0_i32 = arith.constant 0 : i32
    %c0_i32_0 = arith.constant 0 : i32
    %c0_i32_1 = arith.constant 0 : i32
    return %c0_i32, %c0_i32_0 : i32, i32
  }
}

module attributes {stable_mosaic.version = 11 : i64} {
  func.func @_fused_encdec_kernel(%arg0: i32, %arg1: memref<8x192xf32, #tpu.memory_space<vmem>>, %arg2: memref<8x32xf32, #tpu.memory_space<vmem>>, %arg3: memref<192x32xbf16, #tpu.memory_space<vmem>>, %arg4: memref<1x32xf32, #tpu.memory_space<vmem>>, %arg5: memref<32x64xbf16, #tpu.memory_space<vmem>>, %arg6: memref<1x64xf32, #tpu.memory_space<vmem>>, %arg7: memref<64x32xbf16, #tpu.memory_space<vmem>>, %arg8: memref<1x32xf32, #tpu.memory_space<vmem>>, %arg9: memref<32x32xbf16, #tpu.memory_space<vmem>>, %arg10: memref<1x32xf32, #tpu.memory_space<vmem>>, %arg11: memref<32x128xbf16, #tpu.memory_space<vmem>>, %arg12: memref<1x128xf32, #tpu.memory_space<vmem>>, %arg13: memref<128x2xf32, #tpu.memory_space<vmem>>, %arg14: memref<8x128xf32, #tpu.memory_space<vmem>>, %arg15: memref<8x32xf32, #tpu.memory_space<vmem>>, %arg16: memref<8x2xf32, #tpu.memory_space<vmem>>) attributes {dimension_semantics = [#tpu.dimension_semantics<arbitrary>], iteration_bounds = array<i64: 1>, scalar_prefetch = 0 : i64, scratch_operands = 0 : i64, tpu.core_type = #tpu.core_type<tc>, window_params = [{pipeline_mode = #tpu.pipeline_mode<synchronous>, transform_indices = @transform_0, window_bounds = array<i64: 8, 192>}, {pipeline_mode = #tpu.pipeline_mode<synchronous>, transform_indices = @transform_1, window_bounds = array<i64: 8, 32>}, {pipeline_mode = #tpu.pipeline_mode<synchronous>, transform_indices = @transform_2, window_bounds = array<i64: 192, 32>}, {pipeline_mode = #tpu.pipeline_mode<synchronous>, transform_indices = @transform_3, window_bounds = array<i64: 1, 32>}, {pipeline_mode = #tpu.pipeline_mode<synchronous>, transform_indices = @transform_4, window_bounds = array<i64: 32, 64>}, {pipeline_mode = #tpu.pipeline_mode<synchronous>, transform_indices = @transform_5, window_bounds = array<i64: 1, 64>}, {pipeline_mode = #tpu.pipeline_mode<synchronous>, transform_indices = @transform_6, window_bounds = array<i64: 64, 32>}, {pipeline_mode = #tpu.pipeline_mode<synchronous>, transform_indices = @transform_7, window_bounds = array<i64: 1, 32>}, {pipeline_mode = #tpu.pipeline_mode<synchronous>, transform_indices = @transform_8, window_bounds = array<i64: 32, 32>}, {pipeline_mode = #tpu.pipeline_mode<synchronous>, transform_indices = @transform_9, window_bounds = array<i64: 1, 32>}, {pipeline_mode = #tpu.pipeline_mode<synchronous>, transform_indices = @transform_10, window_bounds = array<i64: 32, 128>}, {pipeline_mode = #tpu.pipeline_mode<synchronous>, transform_indices = @transform_11, window_bounds = array<i64: 1, 128>}, {pipeline_mode = #tpu.pipeline_mode<synchronous>, transform_indices = @transform_12, window_bounds = array<i64: 128, 2>}, {pipeline_mode = #tpu.pipeline_mode<synchronous>, transform_indices = @transform_13, window_bounds = array<i64: 8, 128>}, {pipeline_mode = #tpu.pipeline_mode<synchronous>, transform_indices = @transform_14, window_bounds = array<i64: 8, 32>}, {pipeline_mode = #tpu.pipeline_mode<synchronous>, transform_indices = @transform_15, window_bounds = array<i64: 8, 2>}]} {
    %c0 = arith.constant 0 : index
    %c0_0 = arith.constant 0 : index
    %0 = vector.load %arg1[%c0, %c0_0] : memref<8x192xf32, #tpu.memory_space<vmem>>, vector<8x192xf32>
    %1 = arith.truncf %0 : vector<8x192xf32> to vector<8x192xbf16>
    %c0_1 = arith.constant 0 : index
    %c0_2 = arith.constant 0 : index
    %2 = vector.load %arg3[%c0_1, %c0_2] : memref<192x32xbf16, #tpu.memory_space<vmem>>, vector<192x32xbf16>
    %cst = arith.constant dense<0.000000e+00> : vector<8x32xf32>
    %3 = tpu.matmul %1, %2, %cst {dimension_numbers = #tpu.dot_dimension_numbers<[1], [0], [0], [1], [0, 0, 1, 1], [], []>} : vector<8x192xbf16>, vector<192x32xbf16>, vector<8x32xf32> -> vector<8x32xf32>
    %c0_3 = arith.constant 0 : index
    %c0_4 = arith.constant 0 : index
    %4 = vector.load %arg4[%c0_3, %c0_4] : memref<1x32xf32, #tpu.memory_space<vmem>>, vector<1x32xf32>
    %5 = vector.broadcast %4 : vector<1x32xf32> to vector<8x32xf32>
    %6 = arith.addf %3, %5 : vector<8x32xf32>
    %c0_5 = arith.constant 0 : index
    %c0_6 = arith.constant 0 : index
    %7 = vector.load %arg2[%c0_5, %c0_6] : memref<8x32xf32, #tpu.memory_space<vmem>>, vector<8x32xf32>
    %8 = arith.addf %6, %7 : vector<8x32xf32>
    %cst_7 = arith.constant dense<0.000000e+00> : vector<8xf32>
    %9 = vector.multi_reduction <add>, %8, %cst_7 [1] : vector<8x32xf32> to vector<8xf32>
    %10 = vector.shape_cast %9 : vector<8xf32> to vector<8x1xf32>
    %cst_8 = arith.constant 3.200000e+01 : f32
    %11 = vector.broadcast %cst_8 : f32 to vector<8x1xf32>
    %12 = arith.divf %10, %11 : vector<8x1xf32>
    %13 = vector.broadcast %12 : vector<8x1xf32> to vector<8x32xf32>
    %14 = arith.subf %8, %13 : vector<8x32xf32>
    %15 = arith.mulf %14, %14 : vector<8x32xf32>
    %cst_9 = arith.constant dense<0.000000e+00> : vector<8xf32>
    %16 = vector.multi_reduction <add>, %15, %cst_9 [1] : vector<8x32xf32> to vector<8xf32>
    %17 = vector.shape_cast %16 : vector<8xf32> to vector<8x1xf32>
    %cst_10 = arith.constant 3.200000e+01 : f32
    %18 = vector.broadcast %cst_10 : f32 to vector<8x1xf32>
    %19 = arith.divf %17, %18 : vector<8x1xf32>
    %cst_11 = arith.constant 9.99999997E-7 : f32
    %20 = vector.broadcast %cst_11 : f32 to vector<8x1xf32>
    %21 = arith.addf %19, %20 : vector<8x1xf32>
    %22 = math.rsqrt %21 : vector<8x1xf32>
    %23 = vector.broadcast %22 : vector<8x1xf32> to vector<8x32xf32>
    %24 = arith.mulf %14, %23 : vector<8x32xf32>
    %25 = arith.truncf %24 : vector<8x32xf32> to vector<8x32xbf16>
    %c0_12 = arith.constant 0 : index
    %c0_13 = arith.constant 0 : index
    %26 = vector.load %arg5[%c0_12, %c0_13] : memref<32x64xbf16, #tpu.memory_space<vmem>>, vector<32x64xbf16>
    %cst_14 = arith.constant dense<0.000000e+00> : vector<8x64xf32>
    %27 = tpu.matmul %25, %26, %cst_14 {dimension_numbers = #tpu.dot_dimension_numbers<[1], [0], [0], [1], [0, 0, 1, 1], [], []>} : vector<8x32xbf16>, vector<32x64xbf16>, vector<8x64xf32> -> vector<8x64xf32>
    %c0_15 = arith.constant 0 : index
    %c0_16 = arith.constant 0 : index
    %28 = vector.load %arg6[%c0_15, %c0_16] : memref<1x64xf32, #tpu.memory_space<vmem>>, vector<1x64xf32>
    %29 = vector.broadcast %28 : vector<1x64xf32> to vector<8x64xf32>
    %30 = arith.addf %27, %29 : vector<8x64xf32>
    %31 = arith.mulf %30, %30 : vector<8x64xf32>
    %32 = arith.mulf %30, %31 : vector<8x64xf32>
    %cst_17 = arith.constant 4.471500e-02 : f32
    %33 = vector.broadcast %cst_17 : f32 to vector<8x64xf32>
    %34 = arith.mulf %33, %32 : vector<8x64xf32>
    %35 = arith.addf %30, %34 : vector<8x64xf32>
    %cst_18 = arith.constant 0.797884583 : f32
    %36 = vector.broadcast %cst_18 : f32 to vector<8x64xf32>
    %37 = arith.mulf %36, %35 : vector<8x64xf32>
    %38 = math.tanh %37 : vector<8x64xf32>
    %cst_19 = arith.constant 1.000000e+00 : f32
    %39 = vector.broadcast %cst_19 : f32 to vector<8x64xf32>
    %40 = arith.addf %39, %38 : vector<8x64xf32>
    %cst_20 = arith.constant 5.000000e-01 : f32
    %41 = vector.broadcast %cst_20 : f32 to vector<8x64xf32>
    %42 = arith.mulf %41, %40 : vector<8x64xf32>
    %43 = arith.mulf %30, %42 : vector<8x64xf32>
    %44 = arith.truncf %43 : vector<8x64xf32> to vector<8x64xbf16>
    %c0_21 = arith.constant 0 : index
    %c0_22 = arith.constant 0 : index
    %45 = vector.load %arg7[%c0_21, %c0_22] : memref<64x32xbf16, #tpu.memory_space<vmem>>, vector<64x32xbf16>
    %cst_23 = arith.constant dense<0.000000e+00> : vector<8x32xf32>
    %46 = tpu.matmul %44, %45, %cst_23 {dimension_numbers = #tpu.dot_dimension_numbers<[1], [0], [0], [1], [0, 0, 1, 1], [], []>} : vector<8x64xbf16>, vector<64x32xbf16>, vector<8x32xf32> -> vector<8x32xf32>
    %47 = arith.addf %8, %46 : vector<8x32xf32>
    %c0_24 = arith.constant 0 : index
    %c0_25 = arith.constant 0 : index
    %48 = vector.load %arg8[%c0_24, %c0_25] : memref<1x32xf32, #tpu.memory_space<vmem>>, vector<1x32xf32>
    %49 = vector.broadcast %48 : vector<1x32xf32> to vector<8x32xf32>
    %50 = arith.addf %47, %49 : vector<8x32xf32>
    %51 = arith.truncf %50 : vector<8x32xf32> to vector<8x32xbf16>
    %c0_26 = arith.constant 0 : index
    %c0_27 = arith.constant 0 : index
    %52 = vector.load %arg9[%c0_26, %c0_27] : memref<32x32xbf16, #tpu.memory_space<vmem>>, vector<32x32xbf16>
    %cst_28 = arith.constant dense<0.000000e+00> : vector<8x32xf32>
    %53 = tpu.matmul %51, %52, %cst_28 {dimension_numbers = #tpu.dot_dimension_numbers<[1], [0], [0], [1], [0, 0, 1, 1], [], []>} : vector<8x32xbf16>, vector<32x32xbf16>, vector<8x32xf32> -> vector<8x32xf32>
    %c0_29 = arith.constant 0 : index
    %c0_30 = arith.constant 0 : index
    %54 = vector.load %arg10[%c0_29, %c0_30] : memref<1x32xf32, #tpu.memory_space<vmem>>, vector<1x32xf32>
    %55 = vector.broadcast %54 : vector<1x32xf32> to vector<8x32xf32>
    %56 = arith.addf %53, %55 : vector<8x32xf32>
    %57 = arith.truncf %56 : vector<8x32xf32> to vector<8x32xbf16>
    %c0_31 = arith.constant 0 : index
    %c0_32 = arith.constant 0 : index
    %58 = vector.load %arg11[%c0_31, %c0_32] : memref<32x128xbf16, #tpu.memory_space<vmem>>, vector<32x128xbf16>
    %cst_33 = arith.constant dense<0.000000e+00> : vector<8x128xf32>
    %59 = tpu.matmul %57, %58, %cst_33 {dimension_numbers = #tpu.dot_dimension_numbers<[1], [0], [0], [1], [0, 0, 1, 1], [], []>} : vector<8x32xbf16>, vector<32x128xbf16>, vector<8x128xf32> -> vector<8x128xf32>
    %c0_34 = arith.constant 0 : index
    %c0_35 = arith.constant 0 : index
    %60 = vector.load %arg12[%c0_34, %c0_35] : memref<1x128xf32, #tpu.memory_space<vmem>>, vector<1x128xf32>
    %61 = vector.broadcast %60 : vector<1x128xf32> to vector<8x128xf32>
    %62 = arith.addf %59, %61 : vector<8x128xf32>
    %c0_36 = arith.constant 0 : index
    %c0_37 = arith.constant 0 : index
    %63 = vector.load %arg15[%c0_36, %c0_37] : memref<8x32xf32, #tpu.memory_space<vmem>>, vector<8x32xf32>
    tpu.vector_store %arg15[%c0_36, %c0_37], %56 {strides = array<i32>} : memref<8x32xf32, #tpu.memory_space<vmem>>, vector<8x32xf32>,
    %c0_38 = arith.constant 0 : index
    %c0_39 = arith.constant 0 : index
    %64 = vector.load %arg14[%c0_38, %c0_39] : memref<8x128xf32, #tpu.memory_space<vmem>>, vector<8x128xf32>
    tpu.vector_store %arg14[%c0_38, %c0_39], %62 {strides = array<i32>} : memref<8x128xf32, #tpu.memory_space<vmem>>, vector<8x128xf32>,
    %cst_40 = arith.constant 2.63157892 : f32
    %65 = vector.broadcast %cst_40 : f32 to vector<8x128xf32>
    %66 = arith.mulf %62, %65 : vector<8x128xf32>
    %cst_41 = arith.constant dense<0xFF800000> : vector<8xf32>
    %67 = vector.multi_reduction <maximumf>, %66, %cst_41 [1] : vector<8x128xf32> to vector<8xf32>
    %68 = vector.shape_cast %67 : vector<8xf32> to vector<8x1xf32>
    %69 = vector.broadcast %68 : vector<8x1xf32> to vector<8x128xf32>
    %70 = arith.subf %66, %69 : vector<8x128xf32>
    %71 = math.exp %70 : vector<8x128xf32>
    %cst_42 = arith.constant dense<0.000000e+00> : vector<8xf32>
    %72 = vector.multi_reduction <add>, %71, %cst_42 [1] : vector<8x128xf32> to vector<8xf32>
    %73 = vector.shape_cast %72 : vector<8xf32> to vector<8x1xf32>
    %74 = tpu.reciprocal %73 {approx = true} : vector<8x1xf32> -> vector<8x1xf32>
    %75 = vector.broadcast %74 : vector<8x1xf32> to vector<8x128xf32>
    %76 = arith.mulf %71, %75 : vector<8x128xf32>
    %c0_43 = arith.constant 0 : index
    %c0_44 = arith.constant 0 : index
    %77 = vector.load %arg13[%c0_43, %c0_44] : memref<128x2xf32, #tpu.memory_space<vmem>>, vector<128x2xf32>
    %cst_45 = arith.constant dense<0.000000e+00> : vector<8x2xf32>
    %78 = tpu.matmul %76, %77, %cst_45 {dimension_numbers = #tpu.dot_dimension_numbers<[1], [0], [0], [1], [0, 0, 1, 1], [], []>} : vector<8x128xf32>, vector<128x2xf32>, vector<8x2xf32> -> vector<8x2xf32>
    %c0_46 = arith.constant 0 : index
    %c0_47 = arith.constant 0 : index
    %79 = vector.load %arg16[%c0_46, %c0_47] : memref<8x2xf32, #tpu.memory_space<vmem>>, vector<8x2xf32>
    tpu.vector_store %arg16[%c0_46, %c0_47], %78 {strides = array<i32>} : memref<8x2xf32, #tpu.memory_space<vmem>>, vector<8x2xf32>,
    return
  }
  func.func @transform_0(%arg0: i32) -> (i32, i32) {
    %c0_i32 = arith.constant 0 : i32
    %c0_i32_0 = arith.constant 0 : i32
    %c0_i32_1 = arith.constant 0 : i32
    return %c0_i32, %c0_i32_0 : i32, i32
  }
  func.func @transform_1(%arg0: i32) -> (i32, i32) {
    %c0_i32 = arith.constant 0 : i32
    %c0_i32_0 = arith.constant 0 : i32
    %c0_i32_1 = arith.constant 0 : i32
    return %c0_i32, %c0_i32_0 : i32, i32
  }
  func.func @transform_2(%arg0: i32) -> (i32, i32) {
    %c0_i32 = arith.constant 0 : i32
    %c0_i32_0 = arith.constant 0 : i32
    %c0_i32_1 = arith.constant 0 : i32
    return %c0_i32, %c0_i32_0 : i32, i32
  }
  func.func @transform_3(%arg0: i32) -> (i32, i32) {
    %c0_i32 = arith.constant 0 : i32
    %c0_i32_0 = arith.constant 0 : i32
    %c0_i32_1 = arith.constant 0 : i32
    return %c0_i32, %c0_i32_0 : i32, i32
  }
  func.func @transform_4(%arg0: i32) -> (i32, i32) {
    %c0_i32 = arith.constant 0 : i32
    %c0_i32_0 = arith.constant 0 : i32
    %c0_i32_1 = arith.constant 0 : i32
    return %c0_i32, %c0_i32_0 : i32, i32
  }
  func.func @transform_5(%arg0: i32) -> (i32, i32) {
    %c0_i32 = arith.constant 0 : i32
    %c0_i32_0 = arith.constant 0 : i32
    %c0_i32_1 = arith.constant 0 : i32
    return %c0_i32, %c0_i32_0 : i32, i32
  }
  func.func @transform_6(%arg0: i32) -> (i32, i32) {
    %c0_i32 = arith.constant 0 : i32
    %c0_i32_0 = arith.constant 0 : i32
    %c0_i32_1 = arith.constant 0 : i32
    return %c0_i32, %c0_i32_0 : i32, i32
  }
  func.func @transform_7(%arg0: i32) -> (i32, i32) {
    %c0_i32 = arith.constant 0 : i32
    %c0_i32_0 = arith.constant 0 : i32
    %c0_i32_1 = arith.constant 0 : i32
    return %c0_i32, %c0_i32_0 : i32, i32
  }
  func.func @transform_8(%arg0: i32) -> (i32, i32) {
    %c0_i32 = arith.constant 0 : i32
    %c0_i32_0 = arith.constant 0 : i32
    %c0_i32_1 = arith.constant 0 : i32
    return %c0_i32, %c0_i32_0 : i32, i32
  }
  func.func @transform_9(%arg0: i32) -> (i32, i32) {
    %c0_i32 = arith.constant 0 : i32
    %c0_i32_0 = arith.constant 0 : i32
    %c0_i32_1 = arith.constant 0 : i32
    return %c0_i32, %c0_i32_0 : i32, i32
  }
  func.func @transform_10(%arg0: i32) -> (i32, i32) {
    %c0_i32 = arith.constant 0 : i32
    %c0_i32_0 = arith.constant 0 : i32
    %c0_i32_1 = arith.constant 0 : i32
    return %c0_i32, %c0_i32_0 : i32, i32
  }
  func.func @transform_11(%arg0: i32) -> (i32, i32) {
    %c0_i32 = arith.constant 0 : i32
    %c0_i32_0 = arith.constant 0 : i32
    %c0_i32_1 = arith.constant 0 : i32
    return %c0_i32, %c0_i32_0 : i32, i32
  }
  func.func @transform_12(%arg0: i32) -> (i32, i32) {
    %c0_i32 = arith.constant 0 : i32
    %c0_i32_0 = arith.constant 0 : i32
    %c0_i32_1 = arith.constant 0 : i32
    return %c0_i32, %c0_i32_0 : i32, i32
  }
  func.func @transform_13(%arg0: i32) -> (i32, i32) {
    %c0_i32 = arith.constant 0 : i32
    %c0_i32_0 = arith.constant 0 : i32
    %c0_i32_1 = arith.constant 0 : i32
    return %c0_i32, %c0_i32_0 : i32, i32
  }
  func.func @transform_14(%arg0: i32) -> (i32, i32) {
    %c0_i32 = arith.constant 0 : i32
    %c0_i32_0 = arith.constant 0 : i32
    %c0_i32_1 = arith.constant 0 : i32
    return %c0_i32, %c0_i32_0 : i32, i32
  }
  func.func @transform_15(%arg0: i32) -> (i32, i32) {
    %c0_i32 = arith.constant 0 : i32
    %c0_i32_0 = arith.constant 0 : i32
    %c0_i32_1 = arith.constant 0 : i32
    return %c0_i32, %c0_i32_0 : i32, i32
  }
}

</mosaic_0001>

<bundles_post_ra>
// kernel: segmenter_forward.2
= control target key start
LH: loop header
LB: loop body
LE: loop exit
PB: predicated region body
PF: predicated region fallthrough
CT: control target
= control target key end

     0   :  { %v824_v1 = vmov 0   ;;  %vm156_vm0 = vcmask 523264   ;;  %s1104_s0 = inlined_call_operand.vmem [shape: f32[8,192], index: 0, kind: input, shape index: {}]   ;;  %s1105_s1 = inlined_call_operand.vmem [shape: f32[8,32], index: 1, kind: input, shape index: {}]   ;;  %s1106_s2 = inlined_call_operand.vmem [shape: bf16[192,32], index: 2, kind: input, shape index: {}]   ;;  %s1107_s3 = inlined_call_operand.vmem [shape: f32[1,32], index: 3, kind: input, shape index: {}]   ;;  %s1108_s4 = inlined_call_operand.vmem [shape: bf16[32,64], index: 4, kind: input, shape index: {}]   ;;  %s1109_s5 = inlined_call_operand.vmem [shape: f32[1,64], index: 5, kind: input, shape index: {}]   ;;  %s1110_s6 = inlined_call_operand.vmem [shape: bf16[64,32], index: 6, kind: input, shape index: {}]   ;;  %s1111_s7 = inlined_call_operand.vmem [shape: f32[1,32], index: 7, kind: input, shape index: {}]   ;;  %s1112_s8 = inlined_call_operand.vmem [shape: bf16[32,32], index: 8, kind: input, shape index: {}]   ;;  %s1113_s9 = inlined_call_operand.vmem [shape: f32[1,32], index: 9, kind: input, shape index: {}]   ;;  %s1114_s10 = inlined_call_operand.vmem [shape: bf16[32,128], index: 10, kind: input, shape index: {}]   ;;  %s1115_s11 = inlined_call_operand.vmem [shape: f32[1,128], index: 11, kind: input, shape index: {}]   ;;  %s1116_s12 = inlined_call_operand.vmem [shape: f32[128,2], index: 12, kind: input, shape index: {}]   ;;  %s1117_s13 = inlined_call_operand.vmem [shape: f32[8,128], index: 13, kind: output, shape index: {0}]   ;;  %s1118_s14 = inlined_call_operand.hbm [shape: f32[8,32], index: 14, kind: output, shape index: {1}]   ;;  %s1119_s15 = inlined_call_operand.vmem [shape: f32[8,2], index: 15, kind: output, shape index: {2}]  }
   0x1   :  { %v772_v0 = vld [vmem:[%s1106_s2 + $0x38] sm:$0xff]   ;;  %160 = vmatprep.subr.bf16.mxu0 %v824_v1  ;;  %v773_v2 = vld [vmem:[%s1106_s2 + $0x30] sm:$0xff]   ;;  %v774_v3 = vld [vmem:[%s1106_s2 + $0x28] sm:$0xff]  }
   0x2   :  { %161 = vmatpush1.bf16.msra.mxu0 %v772_v0  ;;  %v775_v4 = vld [vmem:[%s1106_s2 + $0x20] sm:$0xff]   ;;  %v776_v5 = vld [vmem:[%s1106_s2 + $0x18] sm:$0xff]   ;;  %v50_v6 = vld [vmem:[%s1104_s0 + $0x8] sm:$0xff] }
   0x3   :  { %162 = vmatprep.subr.bf16.mxu0 %v824_v1  ;;  %v52_v7 = vpack.c.bf16 %v50_v6, %v50_v6  ;;  %v777_v8 = vld [vmem:[%s1106_s2 + $0x10] sm:$0xff]  }
   0x5   :  { %647 = vmatprep.mubr.msk.bf16.mxu0 %vm156_vm0, %v52_v7 }
   0x6   :  { %163 = vmatpush1.bf16.msra.mxu0 %v773_v2 }
   0x7   :  { %164 = vmatprep.subr.bf16.mxu0 %v824_v1 }
   0xa   :  { %165 = vmatpush1.bf16.msra.mxu0 %v774_v3 }
   0xb   :  { %166 = vmatprep.subr.bf16.mxu0 %v824_v1 }
   0xe   :  { %167 = vmatpush1.bf16.msra.mxu0 %v775_v4 }
   0xf   :  { %168 = vmatprep.subr.bf16.mxu0 %v824_v1 }
  0x12   :  { %169 = vmatpush1.bf16.msra.mxu0 %v776_v5 }
  0x13   :  { %170 = vmatprep.subr.bf16.mxu0 %v824_v1 }
  0x14   :  { %21 = vsyncpa [#allocation3], 0  ;;  %v778_v9 = vld [vmem:[%s1106_s2 + $0x8] sm:$0xff]   ;;  %v779_v10 = vld [vmem:[%s1106_s2] sm:$0xff]   ;;  %vm202_vm1 = vcmask 261120   ;;  %v825_v32 = vmov 0.0  }
  0x15   :  { %v780_v11 = vld [vmem:[%s1106_s2 + $0x58] sm:$0xff]   ;;  %v781_v12 = vld [vmem:[%s1106_s2 + $0x50] sm:$0xff]   ;;  %v782_v13 = vld [vmem:[%s1106_s2 + $0x48] sm:$0xff]   ;;  %vm826_vm2 = vmmov 0   ;;  %705 = vmatprep.subr.bf16.mxu1 %v825_v32 }
  0x16   :  { %171 = vmatpush1.bf16.msra.mxu0 %v777_v8  ;;  %v783_v14 = vld [vmem:[%s1106_s2 + $0x40] sm:$0xff]   ;;  %v784_v31 = vld [vmem:[%s1108_s4 + $0x8] sm:$0xff]   ;;  %713 = vmatprep.mubr.msk.bf16.mxu1 %vm826_vm2, %v825_v32  ;;  %v786_v40 = vld [vmem:[%s1110_s6 + $0x18] sm:$0xff]  }
  0x17   :  { %172 = vmatprep.subr.bf16.mxu0 %v824_v1  ;;  %v49_v15 = vld [vmem:[%s1104_s0] sm:$0xff]  ;;  %706 = vmatpush3.bf16.msra.mxu1 %v786_v40  ;;  %v787_v41 = vld [vmem:[%s1110_s6 + $0x10] sm:$0xff]   ;;  %v788_v42 = vld [vmem:[%s1110_s6 + $0x8] sm:$0xff]  }
  0x18   :  { %v51_v16 = vpack.c.bf16 %v49_v15, %v49_v15  ;;  %v634_v17 = vld [vmem:[%s1107_s3] ss:$0 sm:$0xff]  ;;  %707 = vmatprep.subr.bf16.mxu1 %v825_v32  ;;  %v790_v59 = vld [vmem:[%s1112_s8 + $0x8] sm:$0xff]   ;;  %v526_v40 = vld [vmem:[%s1116_s12 + $0x10] sm:$0xff] }
  0x19   :  { %v200_v19 = vld [vmem:[%s1105_s1] sm:$0xff]  ;;  %v792_v4 = vld [vmem:[%s1114_s10 + $0x8] sm:$0xff]  }
  0x1a   :  { %173 = vmatpush1.bf16.msra.mxu0 %v778_v9  ;;  %v785_v33 = vld [vmem:[%s1108_s4] sm:$0xff]  }
  0x1b   :  { %174 = vmatprep.subr.bf16.mxu0 %v824_v1  ;;  %708 = vmatpush3.bf16.msra.mxu1 %v787_v41  ;;  %v789_v43 = vld [vmem:[%s1110_s6] sm:$0xff]   ;;  %v525_v41 = vld [vmem:[%s1116_s12 + $0x8] sm:$0xff] }
  0x1c   :  { %709 = vmatprep.subr.bf16.mxu1 %v825_v32  ;;  %v648_v44 = vld [vmem:[%s1109_s5] ss:$0 sm:$0xff] }
  0x1d   :  { %v791_v61 = vld [vmem:[%s1112_s8] sm:$0xff]  }
  0x1e   :  { %175 = vmatpush1.bf16.msra.mxu0 %v779_v10  ;;  %v657_v63 = vld [vmem:[%s1111_s7] ss:$0 sm:$0xff] }
  0x1f   :  { %184 = vmatprep.subr.bf16.mxu0 %v824_v1  ;;  %710 = vmatpush3.bf16.msra.mxu1 %v788_v42  ;;  %v793_v7 = vld [vmem:[%s1114_s10] sm:$0xff]  }
  0x20   :  { %711 = vmatprep.subr.bf16.mxu1 %v825_v32  ;;  %v658_v8 = vld [vmem:[%s1113_s9] ss:$0 sm:$0xff] }
  0x21   :  { %v662_v15 = vld [vmem:[%s1115_s11] ss:$0 sm:$0xff]  ;;  %s827_s11 = smov [#allocation2]  }
  0x22   :  { %185 = vmatpush2.bf16.msra.mxu0 %v780_v11  ;;  %v524_v42 = vld [vmem:[%s1116_s12] sm:$0xff]  ;;  %s620_s23 = sshll.u32 %s827_s11, 4  ;;  %s621_s23 = int_to_ptr.vmem [resolvable:$true] %s620_s23 }
  0x23   :  { %186 = vmatprep.subr.bf16.mxu0 %v824_v1  ;;  %712 = vmatpush3.bf16.msra.mxu1 %v789_v43  ;;  %p807_p1 = scmp.lt.s32.totalorder %s621_s23, %s621_s23 }
  0x24   :  { %717 = vmatprep.subr.bf16.mxu1 %v825_v32 }
  0x26   :  { %187 = vmatpush2.bf16.msra.mxu0 %v781_v12 }
  0x27   :  { %188 = vmatprep.subr.bf16.mxu0 %v824_v1 }
  0x2a   :  { %189 = vmatpush2.bf16.msra.mxu0 %v782_v13 }
  0x2b   :  { %190 = vmatprep.subr.bf16.mxu0 %v824_v1 }
  0x2e   :  { %191 = vmatpush2.bf16.msra.mxu0 %v783_v14 }
  0x2f   :  { %697 = vmatprep.subr.bf16.mxu0 %v825_v32 }
  0x31   :  { %193 = vmatmul.mubr.bf16.vlgmr.msra.gmra.mxu0 %v51_v16 }
  0x32   :  { %701 = vmatprep.mubr.msk.bf16.mxu0 %vm826_vm2, %v825_v32  ;;  %698 = vmatpush3.bf16.msra.mxu0 %v784_v31 }
  0x33   :  { %699 = vmatprep.subr.bf16.mxu0 %v825_v32 }
  0x36   :  { %700 = vmatpush3.bf16.msra.mxu0 %v785_v33 }
  0xf1   :  { %v194_v18 = vpop.f32.mrf.mxu0 }
  0xf2   :  { %v195_v20 = vadd.f32 %v634_v17, %v194_v18 }
  0xf3   :  { %v196_v21 = vpop.f32.mrf.mxu0 }
  0xf4   :  { %v957_v22 = vadd.f32 %v200_v19, %v195_v20 }
  0xf5   :  { %v197_v23 = vpop.f32.mrf.mxu0 }
  0xf6   :  { %v203_v24 = vsel %vm202_vm1, %v957_v22, 0.0  ;;  %v538_v23 = vld [vmem:[%s1116_s12 + $0x70] sm:$0xff] }
  0xf7   :  { %v198_v25 = vpop.f32.mrf.mxu0  ;;  %204 = vadd.xlane.f32.xlu0 %v203_v24  ;;  %v537_v24 = vld [vmem:[%s1116_s12 + $0x68] sm:$0xff] }
  0xf8   :  { %v536_v25 = vld [vmem:[%s1116_s12 + $0x60] sm:$0xff] }
 0x180   :  { %v205_v26 = vpop.xlane.xlu0 %204 }
 0x181   :  { %v207_v27 = vmul.f32 0.03125, %v205_v26  ;;  %v535_v26 = vld [vmem:[%s1116_s12 + $0x58] sm:$0xff] }
 0x183   :  { %v208_v28 = vsub.f32 %v957_v22, %v207_v27  ;;  %v534_v27 = vld [vmem:[%s1116_s12 + $0x50] sm:$0xff] }
 0x185   :  { %v209_v29 = vmul.f32 %v208_v28, %v208_v28 }
 0x187   :  { %v210_v30 = vsel %vm202_vm1, %v209_v29, 0.0  ;;  %v532_v29 = vld [vmem:[%s1116_s12 + $0x40] sm:$0xff] }
 0x188   :  { %211 = vadd.xlane.f32.xlu0 %v210_v30 }
 0x211   :  { %v212_v34 = vpop.xlane.xlu0 %211 }
 0x212   :  { %v213_v35 = vmul.f32 0.03125, %v212_v34 }
 0x214   :  { %v214_v36 = vadd.f32 1e-06, %v213_v35  ;;  %v531_v35 = vld [vmem:[%s1116_s12 + $0x38] sm:$0xff] }
 0x216   :  { %794 = vrsqrt.f32 %v214_v36  ;;  %v530_v36 = vld [vmem:[%s1116_s12 + $0x30] sm:$0xff] }
 0x223   :  { %v795_v37 = vpop.eup %794 }
 0x224   :  { %v216_v38 = vmul.f32 %v795_v37, %v208_v28  ;;  %v533_v28 = vld [vmem:[%s1116_s12 + $0x48] sm:$0xff] }
 0x225   :  { %v529_v37 = vld [vmem:[%s1116_s12 + $0x28] sm:$0xff] }
 0x226   :  { %v217_v39 = vpack.c.bf16 %v216_v38, %v216_v38  ;;  %v528_v38 = vld [vmem:[%s1116_s12 + $0x20] sm:$0xff] }
 0x228   :  { %702 = vmatmul.mubr.msk.bf16.vlgmr.msra.gmra.mxu0 %vm202_vm1, %v217_v39  ;;  %v527_v39 = vld [vmem:[%s1116_s12 + $0x18] sm:$0xff] }
 0x2e8   :  { %v278_v45 = vpop.f32.mrf.mxu0 }
 0x2e9   :  { %v279_v46 = vadd.f32 %v648_v44, %v278_v45 }
 0x2ea   :  { %v703_v47 = vpop.f32.mrf.mxu0 }
 0x2eb   :  { %v284_v48 = vmul.f32 %v279_v46, %v279_v46 }
 0x2ec   :  { %v281_v49 = vpop.f32.mrf.mxu0 }
 0x2ed   :  { %v285_v50 = vmul.f32 %v284_v48, %v279_v46 }
 0x2ee   :  { %v704_v51 = vpop.f32.mrf.mxu0 }
 0x2ef   :  { %v286_v52 = vmul.f32 0.044715, %v285_v50 }
 0x2f1   :  { %v287_v53 = vadd.f32 %v286_v52, %v279_v46 }
 0x2f3   :  { %v288_v54 = vmul.f32 0.7978846, %v287_v53 }
 0x2f5   :  { %796 = vtanh.f32 %v288_v54 }
 0x302   :  { %v797_v55 = vpop.eup %796 }
 0x303   :  { %v290_v56 = vadd.f32 1.0, %v797_v55 }
 0x305   :  { %v291_v57 = vmul.f32 0.5, %v290_v56 }
 0x307   :  { %v292_v58 = vmul.f32 %v291_v57, %v279_v46 }
 0x309   :  { %v293_v60 = vpack.c.bf16 %v292_v58, %v292_v58 }
 0x30b   :  { %714 = vmatmul.mubr.msk.bf16.vlgmr.msra.gmra.mxu1 %vm156_vm0, %v293_v60 }
 0x30c   :  { %718 = vmatpush3.bf16.msra.mxu1 %v790_v59  ;;  %721 = vmatprep.mubr.msk.bf16.mxu1 %vm826_vm2, %v825_v32 }
 0x30d   :  { %719 = vmatprep.subr.bf16.mxu1 %v825_v32 }
 0x310   :  { %720 = vmatpush3.bf16.msra.mxu1 %v791_v61 }
 0x311   :  { %725 = vmatprep.subr.bf16.mxu1 %v825_v32 }
 0x3cb   :  { %v363_v62 = vpop.f32.mrf.mxu1 }
 0x3cc   :  { %v369_v0 = vadd.f32 %v363_v62, %v957_v22  ;;  %v539_v22 = vld [vmem:[%s1116_s12 + $0x78] sm:$0xff] }
 0x3cd   :  { %v715_v1 = vpop.f32.mrf.mxu1 }
 0x3ce   :  { %v377_v2 = vadd.f32 %v657_v63, %v369_v0 }
 0x3cf   :  { %v366_v3 = vpop.f32.mrf.mxu1 }
 0x3d0   :  { %v378_v5 = vpack.c.bf16 %v377_v2, %v377_v2 }
 0x3d1   :  { %v716_v6 = vpop.f32.mrf.mxu1 }
 0x3d2   :  { %722 = vmatmul.mubr.msk.bf16.vlgmr.msra.gmra.mxu1 %vm202_vm1, %v378_v5 }
 0x3d3   :  { %726 = vmatpush3.bf16.msra.mxu1 %v792_v4  ;;  %729 = vmatprep.mubr.msk.bf16.mxu1 %vm826_vm2, %v825_v32 }
 0x3d4   :  { %727 = vmatprep.subr.bf16.mxu1 %v825_v32 }
 0x3d7   :  { %728 = vmatpush3.bf16.msra.mxu1 %v793_v7 }
 0x3d8   :  { %733 = vmatprep.subr.mxu1 %v825_v32 }
 0x492   :  { %v439_v9 = vpop.f32.mrf.mxu1 }
 0x493   :  { %v440_v10 = vadd.f32 %v658_v8, %v439_v9 }
 0x494   :  { %v723_v11 = vpop.f32.mrf.mxu1 }
 0x495   :  { %v445_v12 = vpack.c.bf16 %v440_v10, %v440_v10  ;;  %512 = vst.msk [vmem:[#allocation2] sm:$0xff] %vm202_vm1, %v440_v10 }
 0x496   :  { %v442_v13 = vpop.f32.mrf.mxu1 }
 0x497   :  { %730 = vmatmul.mubr.msk.bf16.vlgmr.msra.gmra.mxu1 %vm202_vm1, %v445_v12 }
 0x498   :  { %v724_v14 = vpop.f32.mrf.mxu1  ;;  %765 = vmatprep.mubr.msk.f32.mxu1 %vm826_vm2, %v825_v32  ;;  %734 = vmatpush3.msra.mxu1 %v539_v22 }
 0x499   :  { %735 = vmatprep.subr.mxu1 %v825_v32 }
 0x49a   :  { %736 = vmatpush3.msra.mxu1 %v538_v23 }
 0x49b   :  { %737 = vmatprep.subr.mxu1 %v825_v32 }
 0x49c   :  { %738 = vmatpush3.msra.mxu1 %v537_v24 }
 0x49d   :  { %739 = vmatprep.subr.mxu1 %v825_v32 }
 0x49e   :  { %740 = vmatpush3.msra.mxu1 %v536_v25 }
 0x49f   :  { %741 = vmatprep.subr.mxu1 %v825_v32 }
 0x4a0   :  { %742 = vmatpush3.msra.mxu1 %v535_v26 }
 0x4a1   :  { %743 = vmatprep.subr.mxu1 %v825_v32 }
 0x4a2   :  { %744 = vmatpush3.msra.mxu1 %v534_v27 }
 0x4a3   :  { %745 = vmatprep.subr.mxu1 %v825_v32 }
 0x4a4   :  { %746 = vmatpush3.msra.mxu1 %v533_v28 }
 0x4a5   :  { %747 = vmatprep.subr.mxu1 %v825_v32 }
 0x4a6   :  { %748 = vmatpush3.msra.mxu1 %v532_v29 }
 0x4a7   :  { %749 = vmatprep.subr.mxu1 %v825_v32 }
 0x4a8   :  { %750 = vmatpush3.msra.mxu1 %v531_v35 }
 0x4a9   :  { %751 = vmatprep.subr.mxu1 %v825_v32 }
 0x4aa   :  { %752 = vmatpush3.msra.mxu1 %v530_v36 }
 0x4ab   :  { %753 = vmatprep.subr.mxu1 %v825_v32 }
 0x4ac   :  { %754 = vmatpush3.msra.mxu1 %v529_v37 }
 0x4ad   :  { %755 = vmatprep.subr.mxu1 %v825_v32 }
 0x4ae   :  { %756 = vmatpush3.msra.mxu1 %v528_v38 }
 0x4af   :  { %757 = vmatprep.subr.mxu1 %v825_v32 }
 0x4b0   :  { %758 = vmatpush3.msra.mxu1 %v527_v39 }
 0x4b1   :  { %759 = vmatprep.subr.mxu1 %v825_v32 }
 0x4b2   :  { %760 = vmatpush3.msra.mxu1 %v526_v40 }
 0x4b3   :  { %761 = vmatprep.subr.mxu1 %v825_v32 }
 0x4b4   :  { %762 = vmatpush3.msra.mxu1 %v525_v41 }
 0x4b5   :  { %763 = vmatprep.subr.mxu1 %v825_v32 }
 0x4b6   :  { %764 = vmatpush3.msra.mxu1 %v524_v42 }
 0x557   :  { %v506_v16 = vpop.f32.mrf.mxu1 }
 0x558   :  { %v507_v17 = vadd.f32 %v662_v15, %v506_v16 }
 0x559   :  { %v731_v18 = vpop.f32.mrf.mxu1 }
 0x55a   :  { %513 = vst [vmem:[%s1117_s13] sm:$0xff] %v507_v17  ;;  %v514_v19 = vmul.f32 2.631579, %v507_v17  ;;  %s802_s13 = scalar_lea.vmem %s621_s23, 128 }
 0x55b   :  { %v509_v20 = vpop.f32.mrf.mxu1  ;;  %p803_p0 = scmp.ne.s32.totalorder %s621_s23, %s802_s13  ;;  %p808_p2 = scmp.lt.s32.totalorder %s802_s13, %s802_s13 }
 0x55c   :  { %515 = vmax.xlane.f32.xlu1 %v514_v19 }
 0x55d   :  { %v732_v21 = vpop.f32.mrf.mxu1  ;;  %p809_p3 = por %p808_p2, %p807_p1 }
 0x55f   :  { %p810_p4 = pnand %p809_p3, %p803_p0 }
 0x5e5   :  { %v516_v30 = vpop.xlane.xlu1 %515 }
 0x5e6   :  { %v517_v31 = vsub.f32 %v514_v19, %v516_v30 }
 0x5e8   :  { %v518_v33 = vmul.f32 1.442695, %v517_v31 }
 0x5ea   :  { %798 = vpow2.f32 %v518_v33 }
 0x5f7   :  { %v799_v34 = vpop.eup %798 }
 0x5f8   :  { %520 = vadd.xlane.f32.xlu1 %v799_v34 }
 0x681   :  { %v521_v43 = vpop.xlane.xlu1 %520 }
 0x682   :  { %800 = vrcp.f32 %v521_v43 }
 0x68f   :  { %v801_v44 = vpop.eup %800 }
 0x690   :  { %v523_v45 = vmul.f32 %v801_v44, %v799_v34 }
 0x692   :  { %766 = vmatmul.mubr.f32.vlgmr.msra.gmra.mxu1 %v523_v45 }
 0x693   :  { %813 = shalt.err (!%p810_p4)
}
 0x694   :  { %623 = dma.vmem_to_hbm [thread:$0]  %s621_s23, 128, %s1118_s14, [#allocation3]   ;;  %vm610_vm3 = vcmask 15360  }
 0x752   :  { %v606_v32 = vpop.f32.mrf.mxu1 }
 0x753   :  { %611 = vst.msk [vmem:[%s1119_s15] sm:$0xff] %vm610_vm3, %v606_v32 }
 0x754   :  { %v767_v46 = vpop.f32.mrf.mxu1 }
 0x755   :  { %822 = dma.done.wait [#allocation3], 128  }
 0x756   :  { %823 = vsyncadd [#allocation3], 4294967168 }
 0x757   :  { %633 = vsyncpa [#allocation3], 1 }

// kernel: segmenter_forward.3
= control target key start
LH: loop header
LB: loop body
LE: loop exit
PB: predicated region body
PF: predicated region fallthrough
CT: control target
= control target key end

     0   :  { %v1808_v2 = vmov 0   ;;  %s2880_s0 = inlined_call_operand.vmem [shape: f32[512,2], index: 0, kind: input, shape index: {}]   ;;  %s2881_s1 = inlined_call_operand.vmem [shape: f32[1,128], index: 1, kind: input, shape index: {}]   ;;  %s2882_s2 = inlined_call_operand.vmem [shape: f32[1,128], index: 2, kind: input, shape index: {}]   ;;  %s2883_s3 = inlined_call_operand.hbm [shape: f32[512,128], index: 3, kind: output, shape index: {}]  }
   0x1   :  { %v1836_v0 = vld [vmem:[%s2880_s0 + $0x10] sm:$0xff]  ;;  %v1841_v1 = vld [vmem:[%s2880_s0] sm:$0xff]  ;;  %1525 = vset.pattern.permute.xlu1 %v1808_v2  ;;  %1524 = vset.pattern.permute.xlu0 %v1808_v2  ;;  %v1848_v3 = vld [vmem:[%s2880_s0 + $0x18] sm:$0xff] }
   0x2   :  { %92 = vperm.xlu1 %1525, %v1836_v0   ;;  %82 = vperm.xlu0 %1524, %v1841_v1   ;;  %v1853_v4 = vld [vmem:[%s2880_s0 + $0x8] sm:$0xff]  ;;  %v1865_v6 = vld [vmem:[%s2880_s0 + $0x20] sm:$0xff]  ;;  %v1872_v7 = vld [vmem:[%s2880_s0 + $0x38] sm:$0xff] }
   0x3   :  { %v1860_v5 = vld [vmem:[%s2880_s0 + $0x28] sm:$0xff]  ;;  %v1877_v8 = vld [vmem:[%s2880_s0 + $0x30] sm:$0xff]  ;;  %v1889_v10 = vld [vmem:[%s2880_s0 + $0x40] sm:$0xff] }
   0x4   :  { %v1884_v9 = vld [vmem:[%s2880_s0 + $0x48] sm:$0xff]  ;;  %v1896_v11 = vld [vmem:[%s2880_s0 + $0x58] sm:$0xff]  ;;  %v1901_v12 = vld [vmem:[%s2880_s0 + $0x50] sm:$0xff] }
   0x6   :  { %97 = vperm.xlu1 %1525, %v1848_v3   ;;  %87 = vperm.xlu0 %1524, %v1853_v4  }
   0xa   :  { %107 = vperm.xlu1 %1525, %v1860_v5   ;;  %102 = vperm.xlu0 %1524, %v1865_v6  }
   0xe   :  { %117 = vperm.xlu1 %1525, %v1872_v7   ;;  %112 = vperm.xlu0 %1524, %v1877_v8  }
  0x12   :  { %127 = vperm.xlu1 %1525, %v1884_v9   ;;  %122 = vperm.xlu0 %1524, %v1889_v10  }
  0x13   :  { %8 = vsyncpa [#allocation3], 0  ;;  %v1908_v13 = vld [vmem:[%s2880_s0 + $0x68] sm:$0xff]  ;;  %v1913_v14 = vld [vmem:[%s2880_s0 + $0x60] sm:$0xff] }
  0x14   :  { %v1920_v15 = vld [vmem:[%s2880_s0 + $0x78] sm:$0xff]  ;;  %v1925_v16 = vld [vmem:[%s2880_s0 + $0x70] sm:$0xff]  ;;  %v1932_v17 = vld [vmem:[%s2880_s0 + $0x88] sm:$0xff] }
  0x15   :  { %v1937_v18 = vld [vmem:[%s2880_s0 + $0x80] sm:$0xff]  ;;  %v1944_v19 = vld [vmem:[%s2880_s0 + $0x98] sm:$0xff]  ;;  %v1949_v20 = vld [vmem:[%s2880_s0 + $0x90] sm:$0xff] }
  0x16   :  { %137 = vperm.xlu1 %1525, %v1896_v11   ;;  %132 = vperm.xlu0 %1524, %v1901_v12   ;;  %v1956_v21 = vld [vmem:[%s2880_s0 + $0xa8] sm:$0xff]  ;;  %v1961_v22 = vld [vmem:[%s2880_s0 + $0xa0] sm:$0xff]  ;;  %v1968_v23 = vld [vmem:[%s2880_s0 + $0xb8] sm:$0xff] }
  0x17   :  { %v1973_v24 = vld [vmem:[%s2880_s0 + $0xb0] sm:$0xff]  ;;  %v1980_v25 = vld [vmem:[%s2880_s0 + $0xc8] sm:$0xff]  ;;  %v1985_v26 = vld [vmem:[%s2880_s0 + $0xc0] sm:$0xff] }
  0x18   :  { %v1992_v27 = vld [vmem:[%s2880_s0 + $0xd8] sm:$0xff]  ;;  %v1997_v28 = vld [vmem:[%s2880_s0 + $0xd0] sm:$0xff]  ;;  %v2004_v29 = vld [vmem:[%s2880_s0 + $0xe8] sm:$0xff] }
  0x19   :  { %v2009_v30 = vld [vmem:[%s2880_s0 + $0xe0] sm:$0xff]  ;;  %v2016_v31 = vld [vmem:[%s2880_s0 + $0xf8] sm:$0xff]  ;;  %v2021_v32 = vld [vmem:[%s2880_s0 + $0xf0] sm:$0xff] }
  0x1a   :  { %147 = vperm.xlu1 %1525, %v1908_v13   ;;  %142 = vperm.xlu0 %1524, %v1913_v14   ;;  %v2028_v33 = vld [vmem:[%s2880_s0 + $0x108] sm:$0xff]  ;;  %v2033_v34 = vld [vmem:[%s2880_s0 + $0x100] sm:$0xff]  ;;  %v2040_v35 = vld [vmem:[%s2880_s0 + $0x118] sm:$0xff] }
  0x1b   :  { %v2045_v36 = vld [vmem:[%s2880_s0 + $0x110] sm:$0xff]  ;;  %v2052_v37 = vld [vmem:[%s2880_s0 + $0x128] sm:$0xff]  ;;  %v2057_v38 = vld [vmem:[%s2880_s0 + $0x120] sm:$0xff] }
  0x1c   :  { %v2064_v39 = vld [vmem:[%s2880_s0 + $0x138] sm:$0xff]  ;;  %v2069_v40 = vld [vmem:[%s2880_s0 + $0x130] sm:$0xff]  ;;  %v2076_v41 = vld [vmem:[%s2880_s0 + $0x148] sm:$0xff] }
  0x1d   :  { %v2081_v42 = vld [vmem:[%s2880_s0 + $0x140] sm:$0xff]  ;;  %v2088_v43 = vld [vmem:[%s2880_s0 + $0x158] sm:$0xff]  ;;  %v2093_v44 = vld [vmem:[%s2880_s0 + $0x150] sm:$0xff] }
  0x1e   :  { %157 = vperm.xlu1 %1525, %v1920_v15   ;;  %152 = vperm.xlu0 %1524, %v1925_v16   ;;  %v2100_v45 = vld [vmem:[%s2880_s0 + $0x168] sm:$0xff]  ;;  %v2105_v46 = vld [vmem:[%s2880_s0 + $0x160] sm:$0xff]  ;;  %v2112_v47 = vld [vmem:[%s2880_s0 + $0x178] sm:$0xff] }
  0x1f   :  { %v2117_v48 = vld [vmem:[%s2880_s0 + $0x170] sm:$0xff]  ;;  %v2124_v49 = vld [vmem:[%s2880_s0 + $0x188] sm:$0xff]  ;;  %v2129_v50 = vld [vmem:[%s2880_s0 + $0x180] sm:$0xff] }
  0x20   :  { %v2136_v51 = vld [vmem:[%s2880_s0 + $0x198] sm:$0xff]  ;;  %v2141_v52 = vld [vmem:[%s2880_s0 + $0x190] sm:$0xff]  ;;  %v2148_v53 = vld [vmem:[%s2880_s0 + $0x1a8] sm:$0xff] }
  0x21   :  { %v2153_v54 = vld [vmem:[%s2880_s0 + $0x1a0] sm:$0xff]  ;;  %v2160_v55 = vld [vmem:[%s2880_s0 + $0x1b8] sm:$0xff]  ;;  %v2165_v56 = vld [vmem:[%s2880_s0 + $0x1b0] sm:$0xff] }
  0x22   :  { %167 = vperm.xlu1 %1525, %v1932_v17   ;;  %162 = vperm.xlu0 %1524, %v1937_v18   ;;  %v2172_v57 = vld [vmem:[%s2880_s0 + $0x1c8] sm:$0xff]  ;;  %v2177_v58 = vld [vmem:[%s2880_s0 + $0x1c0] sm:$0xff]  ;;  %v2184_v59 = vld [vmem:[%s2880_s0 + $0x1d8] sm:$0xff] }
  0x23   :  { %2902 = vst [vmem:[#allocation5_spill] sm:$0xff] %v2172_v57  ;;  %2903 = vst [vmem:[#allocation6_spill] sm:$0xff] %v2177_v58  ;;  %v2189_v60 = vld [vmem:[%s2880_s0 + $0x1d0] sm:$0xff]  ;;  %v2196_v61 = vld [vmem:[%s2880_s0 + $0x1e8] sm:$0xff] }
  0x24   :  { %2904 = vst [vmem:[#allocation7_spill] sm:$0xff] %v2184_v59  ;;  %2905 = vst [vmem:[#allocation8_spill] sm:$0xff] %v2189_v60  ;;  %v2201_v62 = vld [vmem:[%s2880_s0 + $0x1e0] sm:$0xff]  ;;  %v2208_v63 = vld [vmem:[%s2880_s0 + $0x1f8] sm:$0xff] }
  0x25   :  { %2906 = vst [vmem:[#allocation9_spill] sm:$0xff] %v2196_v61  ;;  %2907 = vst [vmem:[#allocation10_spill] sm:$0xff] %v2201_v62  ;;  %v2213_v2 = vld [vmem:[%s2880_s0 + $0x1f0] sm:$0xff] }
  0x26   :  { %177 = vperm.xlu1 %1525, %v1944_v19   ;;  %172 = vperm.xlu0 %1524, %v1949_v20  }
  0x2a   :  { %187 = vperm.xlu1 %1525, %v1956_v21   ;;  %182 = vperm.xlu0 %1524, %v1961_v22  }
  0x2e   :  { %197 = vperm.xlu1 %1525, %v1968_v23   ;;  %192 = vperm.xlu0 %1524, %v1973_v24  }
  0x32   :  { %207 = vperm.xlu1 %1525, %v1980_v25   ;;  %202 = vperm.xlu0 %1524, %v1985_v26  }
  0x36   :  { %217 = vperm.xlu1 %1525, %v1992_v27   ;;  %212 = vperm.xlu0 %1524, %v1997_v28  }
  0x3a   :  { %227 = vperm.xlu1 %1525, %v2004_v29   ;;  %222 = vperm.xlu0 %1524, %v2009_v30  }
  0x3e   :  { %237 = vperm.xlu1 %1525, %v2016_v31   ;;  %232 = vperm.xlu0 %1524, %v2021_v32  }
  0x42   :  { %247 = vperm.xlu1 %1525, %v2028_v33   ;;  %242 = vperm.xlu0 %1524, %v2033_v34  }
  0x46   :  { %257 = vperm.xlu1 %1525, %v2040_v35   ;;  %252 = vperm.xlu0 %1524, %v2045_v36  }
  0x4a   :  { %267 = vperm.xlu1 %1525, %v2052_v37   ;;  %262 = vperm.xlu0 %1524, %v2057_v38  }
  0x4e   :  { %277 = vperm.xlu1 %1525, %v2064_v39   ;;  %272 = vperm.xlu0 %1524, %v2069_v40  }
  0x52   :  { %287 = vperm.xlu1 %1525, %v2076_v41   ;;  %282 = vperm.xlu0 %1524, %v2081_v42  }
  0x56   :  { %297 = vperm.xlu1 %1525, %v2088_v43   ;;  %292 = vperm.xlu0 %1524, %v2093_v44  }
  0x5a   :  { %307 = vperm.xlu1 %1525, %v2100_v45   ;;  %302 = vperm.xlu0 %1524, %v2105_v46  }
  0x5e   :  { %317 = vperm.xlu1 %1525, %v2112_v47   ;;  %312 = vperm.xlu0 %1524, %v2117_v48  }
  0x62   :  { %327 = vperm.xlu1 %1525, %v2124_v49   ;;  %322 = vperm.xlu0 %1524, %v2129_v50  }
  0x66   :  { %337 = vperm.xlu1 %1525, %v2136_v51   ;;  %332 = vperm.xlu0 %1524, %v2141_v52  }
  0x6a   :  { %347 = vperm.xlu1 %1525, %v2148_v53   ;;  %342 = vperm.xlu0 %1524, %v2153_v54  }
  0x6e   :  { %357 = vperm.xlu1 %1525, %v2160_v55   ;;  %352 = vperm.xlu0 %1524, %v2165_v56  }
  0x72   :  { %367 = vperm.xlu1 %1525, %v2172_v57   ;;  %362 = vperm.xlu0 %1524, %v2177_v58   ;;  %v1809_v57 = vmov 1  }
  0x76   :  { %377 = vperm.xlu1 %1525, %v2184_v59   ;;  %372 = vperm.xlu0 %1524, %v2189_v60  }
  0x7a   :  { %387 = vperm.xlu1 %1525, %v2196_v61   ;;  %382 = vperm.xlu0 %1524, %v2201_v62  }
  0x7d   :  { %v2215_v59 = vpop.permute.xlu1 %92  ;;  %v2217_v60 = vpop.permute.xlu0 %82 }
  0x7e   :  { %2908 = vst [vmem:[#allocation11_spill] sm:$0xff] %v2215_v59  ;;  %2909 = vst [vmem:[#allocation12_spill] sm:$0xff] %v2217_v60  ;;  %397 = vperm.xlu1 %1525, %v2208_v63   ;;  %392 = vperm.xlu0 %1524, %v2213_v2  }
  0x81   :  { %v2221_v61 = vpop.permute.xlu1 %97  ;;  %v2223_v62 = vpop.permute.xlu0 %87 }
  0x82   :  { %2910 = vst [vmem:[#allocation13_spill] sm:$0xff] %v2221_v61  ;;  %1527 = vset.pattern.permute.xlu1 %v1809_v57  ;;  %1526 = vset.pattern.permute.xlu0 %v1809_v57 }
  0x83   :  { %476 = vperm.xlu1 %1527, %v1853_v4   ;;  %472 = vperm.xlu0 %1526, %v1841_v1  }
  0x85   :  { %v2227_v58 = vpop.permute.xlu1 %107  ;;  %v2229_v59 = vpop.permute.xlu0 %102 }
  0x87   :  { %480 = vperm.xlu1 %1527, %v1836_v0   ;;  %484 = vperm.xlu0 %1526, %v1848_v3  }
  0x89   :  { %v2233_v60 = vpop.permute.xlu1 %117  ;;  %v2235_v61 = vpop.permute.xlu0 %112 }
  0x8b   :  { %488 = vperm.xlu1 %1527, %v1865_v6   ;;  %492 = vperm.xlu0 %1526, %v1860_v5  }
  0x8d   :  { %v2239_v57 = vpop.permute.xlu1 %127  ;;  %v2241_v4 = vpop.permute.xlu0 %122 }
  0x8f   :  { %496 = vperm.xlu1 %1527, %v1877_v8   ;;  %500 = vperm.xlu0 %1526, %v1872_v7  }
  0x91   :  { %v2245_v1 = vpop.permute.xlu1 %137  ;;  %v2247_v0 = vpop.permute.xlu0 %132 }
  0x93   :  { %504 = vperm.xlu1 %1527, %v1889_v10   ;;  %508 = vperm.xlu0 %1526, %v1884_v9  }
  0x95   :  { %v2251_v3 = vpop.permute.xlu1 %147  ;;  %v2253_v6 = vpop.permute.xlu0 %142 }
  0x97   :  { %512 = vperm.xlu1 %1527, %v1901_v12   ;;  %516 = vperm.xlu0 %1526, %v1896_v11  }
  0x99   :  { %v2257_v5 = vpop.permute.xlu1 %157  ;;  %v2259_v8 = vpop.permute.xlu0 %152 }
  0x9b   :  { %520 = vperm.xlu1 %1527, %v1913_v14   ;;  %524 = vperm.xlu0 %1526, %v1908_v13  }
  0x9d   :  { %v2263_v7 = vpop.permute.xlu1 %167  ;;  %v2265_v10 = vpop.permute.xlu0 %162 }
  0x9f   :  { %528 = vperm.xlu1 %1527, %v1925_v16   ;;  %532 = vperm.xlu0 %1526, %v1920_v15  }
  0xa1   :  { %v2269_v9 = vpop.permute.xlu1 %177  ;;  %v2271_v12 = vpop.permute.xlu0 %172 }
  0xa3   :  { %536 = vperm.xlu1 %1527, %v1937_v18   ;;  %540 = vperm.xlu0 %1526, %v1932_v17  }
  0xa5   :  { %v2275_v11 = vpop.permute.xlu1 %187  ;;  %v2277_v14 = vpop.permute.xlu0 %182 }
  0xa7   :  { %544 = vperm.xlu1 %1527, %v1949_v20   ;;  %548 = vperm.xlu0 %1526, %v1944_v19  }
  0xa9   :  { %v2281_v13 = vpop.permute.xlu1 %197  ;;  %v2283_v16 = vpop.permute.xlu0 %192 }
  0xab   :  { %552 = vperm.xlu1 %1527, %v1961_v22   ;;  %556 = vperm.xlu0 %1526, %v1956_v21  }
  0xad   :  { %v2287_v15 = vpop.permute.xlu1 %207  ;;  %v2289_v18 = vpop.permute.xlu0 %202 }
  0xaf   :  { %560 = vperm.xlu1 %1527, %v1973_v24   ;;  %564 = vperm.xlu0 %1526, %v1968_v23  }
  0xb1   :  { %v2293_v17 = vpop.permute.xlu1 %217  ;;  %v2295_v20 = vpop.permute.xlu0 %212 }
  0xb3   :  { %568 = vperm.xlu1 %1527, %v1985_v26   ;;  %572 = vperm.xlu0 %1526, %v1980_v25  }
  0xb5   :  { %v2299_v19 = vpop.permute.xlu1 %227  ;;  %v2301_v22 = vpop.permute.xlu0 %222 }
  0xb7   :  { %576 = vperm.xlu1 %1527, %v1997_v28   ;;  %580 = vperm.xlu0 %1526, %v1992_v27  }
  0xb9   :  { %v2305_v21 = vpop.permute.xlu1 %237  ;;  %v2307_v24 = vpop.permute.xlu0 %232 }
  0xbb   :  { %584 = vperm.xlu1 %1527, %v2009_v30   ;;  %588 = vperm.xlu0 %1526, %v2004_v29  }
  0xbd   :  { %v2311_v23 = vpop.permute.xlu1 %247  ;;  %v2313_v26 = vpop.permute.xlu0 %242 }
  0xbf   :  { %592 = vperm.xlu1 %1527, %v2021_v32   ;;  %596 = vperm.xlu0 %1526, %v2016_v31  }
  0xc1   :  { %v2317_v25 = vpop.permute.xlu1 %257  ;;  %v2319_v28 = vpop.permute.xlu0 %252 }
  0xc3   :  { %600 = vperm.xlu1 %1527, %v2033_v34   ;;  %604 = vperm.xlu0 %1526, %v2028_v33  }
  0xc5   :  { %v2323_v27 = vpop.permute.xlu1 %267  ;;  %v2325_v30 = vpop.permute.xlu0 %262 }
  0xc7   :  { %608 = vperm.xlu1 %1527, %v2045_v36   ;;  %612 = vperm.xlu0 %1526, %v2040_v35  }
  0xc9   :  { %v2329_v29 = vpop.permute.xlu1 %277  ;;  %v2331_v32 = vpop.permute.xlu0 %272 }
  0xcb   :  { %616 = vperm.xlu1 %1527, %v2057_v38   ;;  %620 = vperm.xlu0 %1526, %v2052_v37  }
  0xcd   :  { %v2335_v31 = vpop.permute.xlu1 %287  ;;  %v2337_v34 = vpop.permute.xlu0 %282 }
  0xcf   :  { %624 = vperm.xlu1 %1527, %v2069_v40   ;;  %628 = vperm.xlu0 %1526, %v2064_v39  }
  0xd1   :  { %v2341_v33 = vpop.permute.xlu1 %297  ;;  %v2343_v36 = vpop.permute.xlu0 %292 }
  0xd2   :  { %2911 = vst [vmem:[#allocation14_spill] sm:$0xff] %v2341_v33 }
  0xd3   :  { %632 = vperm.xlu1 %1527, %v2081_v42   ;;  %636 = vperm.xlu0 %1526, %v2076_v41  }
  0xd5   :  { %v2347_v35 = vpop.permute.xlu1 %307  ;;  %v2349_v38 = vpop.permute.xlu0 %302 }
  0xd6   :  { %2912 = vst [vmem:[#allocation15_spill] sm:$0xff] %v2347_v35  ;;  %2913 = vst [vmem:[#allocation16_spill] sm:$0xff] %v2349_v38 }
  0xd7   :  { %640 = vperm.xlu1 %1527, %v2093_v44   ;;  %644 = vperm.xlu0 %1526, %v2088_v43  }
  0xd9   :  { %v2353_v37 = vpop.permute.xlu1 %317  ;;  %v2355_v40 = vpop.permute.xlu0 %312 }
  0xda   :  { %2914 = vst [vmem:[#allocation17_spill] sm:$0xff] %v2353_v37  ;;  %2915 = vst [vmem:[#allocation18_spill] sm:$0xff] %v2355_v40 }
  0xdb   :  { %648 = vperm.xlu1 %1527, %v2105_v46   ;;  %652 = vperm.xlu0 %1526, %v2100_v45  }
  0xdd   :  { %v2359_v39 = vpop.permute.xlu1 %327  ;;  %v2361_v42 = vpop.permute.xlu0 %322 }
  0xde   :  { %2916 = vst [vmem:[#allocation19_spill] sm:$0xff] %v2359_v39  ;;  %2917 = vst [vmem:[#allocation20_spill] sm:$0xff] %v2361_v42 }
  0xdf   :  { %656 = vperm.xlu1 %1527, %v2117_v48   ;;  %660 = vperm.xlu0 %1526, %v2112_v47  }
  0xe1   :  { %v2365_v41 = vpop.permute.xlu1 %337  ;;  %v2367_v44 = vpop.permute.xlu0 %332 }
  0xe2   :  { %2918 = vst [vmem:[#allocation21_spill] sm:$0xff] %v2365_v41  ;;  %2919 = vst [vmem:[#allocation22_spill] sm:$0xff] %v2367_v44  ;;  %v2939_v41 = vld [vmem:[#allocation12_spill] sm:$0xff] }
  0xe3   :  { %664 = vperm.xlu1 %1527, %v2129_v50   ;;  %668 = vperm.xlu0 %1526, %v2124_v49  }
  0xe5   :  { %v2371_v43 = vpop.permute.xlu1 %347  ;;  %v2373_v46 = vpop.permute.xlu0 %342 }
  0xe6   :  { %2920 = vst [vmem:[#allocation23_spill] sm:$0xff] %v2371_v43  ;;  %2921 = vst [vmem:[#allocation24_spill] sm:$0xff] %v2373_v46 }
  0xe7   :  { %672 = vperm.xlu1 %1527, %v2141_v52   ;;  %676 = vperm.xlu0 %1526, %v2136_v51   ;;  %v2928_v51 = vld [vmem:[#allocation6_spill] sm:$0xff] }
  0xe9   :  { %v2377_v45 = vpop.permute.xlu1 %357  ;;  %v2379_v48 = vpop.permute.xlu0 %352 }
  0xea   :  { %2922 = vst [vmem:[#allocation25_spill] sm:$0xff] %v2377_v45  ;;  %2923 = vst [vmem:[#allocation26_spill] sm:$0xff] %v2379_v48  ;;  %v2929_v45 = vld [vmem:[#allocation5_spill] sm:$0xff] }
  0xeb   :  { %680 = vperm.xlu1 %1527, %v2153_v54   ;;  %684 = vperm.xlu0 %1526, %v2148_v53   ;;  %v2932_v53 = vld [vmem:[#allocation8_spill] sm:$0xff] }
  0xed   :  { %v2383_v47 = vpop.permute.xlu1 %367  ;;  %v2385_v50 = vpop.permute.xlu0 %362 }
  0xee   :  { %2924 = vst [vmem:[#allocation27_spill] sm:$0xff] %v2383_v47  ;;  %2925 = vst [vmem:[#allocation28_spill] sm:$0xff] %v2385_v50  ;;  %v2933_v47 = vld [vmem:[#allocation7_spill] sm:$0xff] }
  0xef   :  { %688 = vperm.xlu1 %1527, %v2165_v56   ;;  %692 = vperm.xlu0 %1526, %v2160_v55   ;;  %v2936_v55 = vld [vmem:[#allocation10_spill] sm:$0xff] }
  0xf1   :  { %v2389_v49 = vpop.permute.xlu1 %377  ;;  %v2391_v52 = vpop.permute.xlu0 %372 }
  0xf2   :  { %2926 = vst [vmem:[#allocation29_spill] sm:$0xff] %v2389_v49  ;;  %2927 = vst [vmem:[#allocation30_spill] sm:$0xff] %v2391_v52  ;;  %v2937_v49 = vld [vmem:[#allocation9_spill] sm:$0xff] }
  0xf3   :  { %696 = vperm.xlu1 %1527, %v2928_v51   ;;  %700 = vperm.xlu0 %1526, %v2929_v45   ;;  %v2410_v45 = vld [vmem:[%s2882_s2] ss:$0 sm:$0xff] }
  0xf4   :  { %v2415_v51 = vld [vmem:[%s2881_s1] ss:$0 sm:$0xff] }
  0xf5   :  { %v2395_v48 = vpop.permute.xlu1 %387  ;;  %v2397_v54 = vpop.permute.xlu0 %382 }
  0xf6   :  { %2930 = vst [vmem:[#allocation6_spill] sm:$0xff] %v2395_v48  ;;  %2931 = vst [vmem:[#allocation5_spill] sm:$0xff] %v2397_v54 }
  0xf7   :  { %704 = vperm.xlu1 %1527, %v2932_v53   ;;  %708 = vperm.xlu0 %1526, %v2933_v47   ;;  %v407_v47 = vsub.f32 %v2223_v62, %v2415_v51  ;;  %v406_v62 = vsub.f32 %v2939_v41, %v2415_v51  ;;  %v411_v41 = vsub.f32 %v2227_v58, %v2415_v51 }
  0xf9   :  { %v2401_v50 = vpop.permute.xlu1 %397  ;;  %v2403_v56 = vpop.permute.xlu0 %392  ;;  %v798_v52 = vmul.f32 %v407_v47, %v407_v47  ;;  %v2940_v47 = vld [vmem:[#allocation13_spill] sm:$0xff] }
  0xfa   :  { %2934 = vst [vmem:[#allocation8_spill] sm:$0xff] %v2401_v50  ;;  %2935 = vst [vmem:[#allocation7_spill] sm:$0xff] %v2403_v56  ;;  %v409_v37 = vsub.f32 %v2940_v47, %v2415_v51 }
  0xfb   :  { %712 = vperm.xlu1 %1527, %v2936_v55   ;;  %716 = vperm.xlu0 %1526, %v2937_v49   ;;  %v2938_v49 = vld [vmem:[#allocation11_spill] sm:$0xff] }
  0xfc   :  { %v408_v55 = vsub.f32 %v2938_v49, %v2415_v51  ;;  %v410_v49 = vsub.f32 %v2229_v59, %v2415_v51  ;;  %v412_v59 = vsub.f32 %v2235_v61, %v2415_v51 }
  0xfe   :  { %v477_v53 = vpop.permute.xlu1 %476  ;;  %v473_v50 = vpop.permute.xlu0 %472 }
  0xff   :  { %v734_v48 = vsub.f32 %v477_v53, %v2410_v45  ;;  %720 = vperm.xlu1 %1527, %v2213_v2   ;;  %724 = vperm.xlu0 %1526, %v2208_v63   ;;  %v733_v54 = vsub.f32 %v473_v50, %v2410_v45  ;;  %v799_v53 = vmul.f32 %v408_v55, %v408_v55 }
 0x100   :  { %v797_v50 = vmul.f32 %v406_v62, %v406_v62  ;;  %v414_v55 = vsub.f32 %v2241_v4, %v2415_v51  ;;  %v803_v4 = vmul.f32 %v412_v59, %v412_v59  ;;  %v416_v59 = vsub.f32 %v2247_v0, %v2415_v51 }
 0x101   :  { %v862_v56 = vmul.f32 %v734_v48, %v734_v48  ;;  %v861_v39 = vmul.f32 %v733_v54, %v733_v54 }
 0x102   :  { %v481_v46 = vpop.permute.xlu1 %480  ;;  %v485_v43 = vpop.permute.xlu0 %484 }
 0x103   :  { %v735_v44 = vsub.f32 %v481_v46, %v2410_v45  ;;  %v926_v42 = vadd.f32 %v862_v56, %v798_v52  ;;  %v736_v63 = vsub.f32 %v485_v43, %v2410_v45  ;;  %v925_v54 = vadd.f32 %v861_v39, %v797_v50 }
 0x104   :  { %v801_v56 = vmul.f32 %v410_v49, %v410_v49 }
 0x105   :  { %v863_v2 = vmul.f32 %v735_v44, %v735_v44  ;;  %v990_v46 = vmul.f32 -0.02, %v926_v42  ;;  %v864_v43 = vmul.f32 %v736_v63, %v736_v63  ;;  %v413_v63 = vsub.f32 %v2233_v60, %v2415_v51 }
 0x106   :  { %v489_v48 = vpop.permute.xlu1 %488  ;;  %v493_v40 = vpop.permute.xlu0 %492  ;;  %v989_v61 = vmul.f32 -0.02, %v925_v54 }
 0x107   :  { %v927_v35 = vadd.f32 %v863_v2, %v799_v53  ;;  %v737_v52 = vsub.f32 %v489_v48, %v2410_v45  ;;  %v738_v44 = vsub.f32 %v493_v40, %v2410_v45  ;;  %v800_v2 = vmul.f32 %v409_v37, %v409_v37 }
 0x108   :  { %v802_v48 = vmul.f32 %v411_v41, %v411_v41  ;;  %v1055_v33 = vmul.f32 1.442695, %v990_v46  ;;  %v805_v37 = vmul.f32 %v414_v55, %v414_v55 }
 0x109   :  { %v865_v62 = vmul.f32 %v737_v52, %v737_v52  ;;  %v991_v38 = vmul.f32 -0.02, %v927_v35  ;;  %v866_v58 = vmul.f32 %v738_v44, %v738_v44  ;;  %v928_v49 = vadd.f32 %v864_v43, %v800_v2 }
 0x10a   :  { %v497_v47 = vpop.permute.xlu1 %496  ;;  %v501_v53 = vpop.permute.xlu0 %500  ;;  %v415_v52 = vsub.f32 %v2239_v57, %v2415_v51  ;;  %v417_v35 = vsub.f32 %v2245_v1, %v2415_v51  ;;  %1528 = vpow2.f32 %v1055_v33  ;;  %v1053_v57 = vmul.f32 1.442695, %v989_v61 }
 0x10b   :  { %v739_v42 = vsub.f32 %v497_v47, %v2410_v45  ;;  %v929_v40 = vadd.f32 %v865_v62, %v801_v56  ;;  %v740_v39 = vsub.f32 %v501_v53, %v2410_v45  ;;  %v1057_v46 = vmul.f32 1.442695, %v991_v38 }
 0x10c   :  { %v930_v56 = vadd.f32 %v866_v58, %v802_v48  ;;  %v992_v55 = vmul.f32 -0.02, %v928_v49  ;;  %v804_v2 = vmul.f32 %v413_v63, %v413_v63  ;;  %v806_v1 = vmul.f32 %v415_v52, %v415_v52 }
 0x10d   :  { %v867_v50 = vmul.f32 %v739_v42, %v739_v42  ;;  %v993_v60 = vmul.f32 -0.02, %v929_v40  ;;  %v868_v43 = vmul.f32 %v740_v39, %v740_v39  ;;  %v808_v42 = vmul.f32 %v417_v35, %v417_v35 }
 0x10e   :  { %v505_v44 = vpop.permute.xlu1 %504  ;;  %v509_v41 = vpop.permute.xlu0 %508  ;;  %v418_v38 = vsub.f32 %v2253_v6, %v2415_v51  ;;  %1530 = vpow2.f32 %v1057_v46  ;;  %v807_v61 = vmul.f32 %v416_v59, %v416_v59  ;;  %v1059_v49 = vmul.f32 1.442695, %v992_v55 }
 0x10f   :  { %v741_v62 = vsub.f32 %v505_v44, %v2410_v45  ;;  %v742_v47 = vsub.f32 %v509_v41, %v2410_v45  ;;  %v931_v54 = vadd.f32 %v867_v50, %v803_v4  ;;  %v994_v44 = vmul.f32 -0.02, %v930_v56 }
 0x110   :  { %v1061_v50 = vmul.f32 1.442695, %v993_v60  ;;  %v932_v4 = vadd.f32 %v868_v43, %v804_v2  ;;  %1532 = vpow2.f32 %v1053_v57  ;;  %v419_v52 = vsub.f32 %v2251_v3, %v2415_v51 }
 0x111   :  { %v869_v53 = vmul.f32 %v741_v62, %v741_v62  ;;  %v870_v40 = vmul.f32 %v742_v47, %v742_v47  ;;  %v995_v39 = vmul.f32 -0.02, %v931_v54  ;;  %v809_v6 = vmul.f32 %v418_v38, %v418_v38 }
 0x112   :  { %v513_v58 = vpop.permute.xlu1 %512  ;;  %v517_v48 = vpop.permute.xlu0 %516  ;;  %v420_v35 = vsub.f32 %v2259_v8, %v2415_v51  ;;  %v1063_v56 = vmul.f32 1.442695, %v994_v44  ;;  %1534 = vpow2.f32 %v1061_v50  ;;  %v996_v43 = vmul.f32 -0.02, %v932_v4 }
 0x113   :  { %v933_v33 = vadd.f32 %v869_v53, %v805_v37  ;;  %v743_v0 = vsub.f32 %v513_v58, %v2410_v45  ;;  %v744_v63 = vsub.f32 %v517_v48, %v2410_v45  ;;  %v934_v47 = vadd.f32 %v870_v40, %v806_v1 }
 0x114   :  { %v1065_v54 = vmul.f32 1.442695, %v995_v39  ;;  %1536 = vpow2.f32 %v1059_v49  ;;  %v421_v8 = vsub.f32 %v2257_v5, %v2415_v51  ;;  %v811_v53 = vmul.f32 %v420_v35, %v420_v35 }
 0x115   :  { %v871_v41 = vmul.f32 %v743_v0, %v743_v0  ;;  %v997_v62 = vmul.f32 -0.02, %v933_v33  ;;  %v872_v57 = vmul.f32 %v744_v63, %v744_v63  ;;  %v423_v2 = vsub.f32 %v2263_v7, %v2415_v51 }
 0x116   :  { %v521_v37 = vpop.permute.xlu1 %520  ;;  %v525_v46 = vpop.permute.xlu0 %524  ;;  %v422_v1 = vsub.f32 %v2265_v10, %v2415_v51  ;;  %1538 = vpow2.f32 %v1063_v56  ;;  %v998_v44 = vmul.f32 -0.02, %v934_v47  ;;  %v1067_v40 = vmul.f32 1.442695, %v996_v43 }
 0x117   :  { %v745_v60 = vsub.f32 %v521_v37, %v2410_v45  ;;  %v935_v59 = vadd.f32 %v871_v41, %v807_v61  ;;  %v746_v3 = vsub.f32 %v525_v46, %v2410_v45  ;;  %v1069_v48 = vmul.f32 1.442695, %v997_v62  ;;  %v2470_v4 = vpop.eup %1528 }
 0x118   :  { %1540 = vpow2.f32 %v1065_v54  ;;  %v936_v5 = vadd.f32 %v872_v57, %v808_v42  ;;  %v810_v49 = vmul.f32 %v419_v52, %v419_v52  ;;  %v812_v10 = vmul.f32 %v421_v8, %v421_v8 }
 0x119   :  { %v873_v55 = vmul.f32 %v745_v60, %v745_v60  ;;  %v999_v50 = vmul.f32 -0.02, %v935_v59  ;;  %v874_v0 = vmul.f32 %v746_v3, %v746_v3  ;;  %v814_v63 = vmul.f32 %v423_v2, %v423_v2 }
 0x11a   :  { %v529_v38 = vpop.permute.xlu1 %528  ;;  %v533_v58 = vpop.permute.xlu0 %532  ;;  %v424_v35 = vsub.f32 %v2271_v12, %v2415_v51  ;;  %v813_v46 = vmul.f32 %v422_v1, %v422_v1  ;;  %1542 = vpow2.f32 %v1069_v48  ;;  %v1000_v54 = vmul.f32 -0.02, %v936_v5 }
 0x11b   :  { %v747_v33 = vsub.f32 %v529_v38, %v2410_v45  ;;  %v937_v39 = vadd.f32 %v873_v55, %v809_v6  ;;  %v748_v7 = vsub.f32 %v533_v58, %v2410_v45  ;;  %v1071_v6 = vmul.f32 1.442695, %v998_v44  ;;  %v2476_v62 = vpop.eup %1530 }
 0x11c   :  { %v1073_v42 = vmul.f32 1.442695, %v999_v50  ;;  %1544 = vpow2.f32 %v1067_v40  ;;  %v938_v43 = vadd.f32 %v874_v0, %v810_v49  ;;  %v425_v57 = vsub.f32 %v2269_v9, %v2415_v51 }
 0x11d   :  { %v875_v61 = vmul.f32 %v747_v33, %v747_v33  ;;  %v1001_v47 = vmul.f32 -0.02, %v937_v39  ;;  %v876_v12 = vmul.f32 %v748_v7, %v748_v7  ;;  %v2480_v59 = vpop.eup %1532  ;;  %v815_v55 = vmul.f32 %v424_v35, %v424_v35 }
 0x11e   :  { %v537_v41 = vpop.permute.xlu1 %536  ;;  %1183 = vadd.xlane.f32.xlu0 %v2470_v4  ;;  %v541_v37 = vpop.permute.xlu0 %540  ;;  %v426_v3 = vsub.f32 %v2277_v14, %v2415_v51  ;;  %1546 = vpow2.f32 %v1071_v6  ;;  %v1075_v14 = vmul.f32 1.442695, %v1000_v54  ;;  %v1002_v40 = vmul.f32 -0.02, %v938_v43 }
 0x11f   :  { %v939_v56 = vadd.f32 %v875_v61, %v811_v53  ;;  %v749_v60 = vsub.f32 %v537_v41, %v2410_v45  ;;  %v750_v52 = vsub.f32 %v541_v37, %v2410_v45  ;;  %1548 = vpow2.f32 %v1073_v42  ;;  %v2490_v33 = vpop.eup %1534 }
 0x120   :  { %v1077_v48 = vmul.f32 1.442695, %v1001_v47  ;;  %v940_v50 = vadd.f32 %v876_v12, %v812_v10  ;;  %v427_v0 = vsub.f32 %v2275_v11, %v2415_v51  ;;  %v817_v61 = vmul.f32 %v426_v3, %v426_v3 }
 0x121   :  { %v877_v8 = vmul.f32 %v749_v60, %v749_v60  ;;  %v1003_v1 = vmul.f32 -0.02, %v939_v56  ;;  %v878_v38 = vmul.f32 %v750_v52, %v750_v52  ;;  %v2492_v5 = vpop.eup %1536  ;;  %v429_v7 = vsub.f32 %v2281_v13, %v2415_v51 }
 0x122   :  { %v545_v53 = vpop.permute.xlu1 %544  ;;  %1185 = vadd.xlane.f32.xlu0 %v2476_v62  ;;  %v549_v2 = vpop.permute.xlu0 %548  ;;  %v428_v49 = vsub.f32 %v2283_v16, %v2415_v51  ;;  %1550 = vpow2.f32 %v1077_v48  ;;  %v1079_v16 = vmul.f32 1.442695, %v1002_v40  ;;  %v1004_v60 = vmul.f32 -0.02, %v940_v50 }
 0x123   :  { %v751_v58 = vsub.f32 %v545_v53, %v2410_v45  ;;  %1181 = vadd.xlane.f32.xlu1 %v2480_v59  ;;  %v941_v44 = vadd.f32 %v877_v8, %v813_v46  ;;  %v752_v9 = vsub.f32 %v549_v2, %v2410_v45  ;;  %v1081_v37 = vmul.f32 1.442695, %v1003_v1  ;;  %v2504_v11 = vpop.eup %1538 }
 0x124   :  { %v942_v46 = vadd.f32 %v878_v38, %v814_v63  ;;  %1552 = vpow2.f32 %v1075_v14  ;;  %v816_v54 = vmul.f32 %v425_v57, %v425_v57  ;;  %v818_v63 = vmul.f32 %v427_v0, %v427_v0 }
 0x125   :  { %v879_v39 = vmul.f32 %v751_v58, %v751_v58  ;;  %v1005_v56 = vmul.f32 -0.02, %v941_v44  ;;  %v880_v42 = vmul.f32 %v752_v9, %v752_v9  ;;  %v2506_v47 = vpop.eup %1540  ;;  %v820_v43 = vmul.f32 %v429_v7, %v429_v7 }
 0x126   :  { %v553_v35 = vpop.permute.xlu1 %552  ;;  %1189 = vadd.xlane.f32.xlu0 %v2490_v33  ;;  %v557_v41 = vpop.permute.xlu0 %556  ;;  %v430_v12 = vsub.f32 %v2289_v18, %v2415_v51  ;;  %1554 = vpow2.f32 %v1081_v37  ;;  %v1006_v53 = vmul.f32 -0.02, %v942_v46  ;;  %v819_v44 = vmul.f32 %v428_v49, %v428_v49 }
 0x127   :  { %v753_v10 = vsub.f32 %v553_v35, %v2410_v45  ;;  %v754_v6 = vsub.f32 %v557_v41, %v2410_v45  ;;  %1187 = vadd.xlane.f32.xlu1 %v2492_v5  ;;  %v943_v13 = vadd.f32 %v879_v39, %v815_v55  ;;  %v2512_v1 = vpop.eup %1542  ;;  %v1085_v38 = vmul.f32 1.442695, %v1005_v56 }
 0x128   :  { %v944_v57 = vadd.f32 %v880_v42, %v816_v54  ;;  %1556 = vpow2.f32 %v1079_v16  ;;  %v1083_v18 = vmul.f32 1.442695, %v1004_v60  ;;  %v431_v40 = vsub.f32 %v2287_v15, %v2415_v51 }
 0x129   :  { %v881_v52 = vmul.f32 %v753_v10, %v753_v10  ;;  %v882_v2 = vmul.f32 %v754_v6, %v754_v6  ;;  %v1007_v58 = vmul.f32 -0.02, %v943_v13  ;;  %v2516_v14 = vpop.eup %1544  ;;  %v821_v50 = vmul.f32 %v430_v12, %v430_v12 }
 0x12a   :  { %v561_v3 = vpop.permute.xlu1 %560  ;;  %1193 = vadd.xlane.f32.xlu0 %v2506_v47  ;;  %v565_v8 = vpop.permute.xlu0 %564  ;;  %v432_v39 = vsub.f32 %v2295_v20, %v2415_v51  ;;  %v1087_v35 = vmul.f32 1.442695, %v1006_v53  ;;  %1558 = vpow2.f32 %v1085_v38  ;;  %v1008_v10 = vmul.f32 -0.02, %v944_v57 }
 0x12b   :  { %v945_v55 = vadd.f32 %v881_v52, %v817_v61  ;;  %1191 = vadd.xlane.f32.xlu1 %v2504_v11  ;;  %v755_v48 = vsub.f32 %v561_v3, %v2410_v45  ;;  %v756_v9 = vsub.f32 %v565_v8, %v2410_v45  ;;  %v946_v41 = vadd.f32 %v882_v2, %v818_v63  ;;  %v2525_v46 = vpop.eup %1546 }
 0x12c   :  { %v1089_v15 = vmul.f32 1.442695, %v1007_v58  ;;  %v2527_v56 = vpop.eup %1548  ;;  %1560 = vpow2.f32 %v1083_v18  ;;  %v433_v16 = vsub.f32 %v2293_v17, %v2415_v51  ;;  %v823_v60 = vmul.f32 %v432_v39, %v432_v39 }
 0x12d   :  { %v883_v0 = vmul.f32 %v755_v48, %v755_v48  ;;  %v1009_v49 = vmul.f32 -0.02, %v945_v55  ;;  %v884_v20 = vmul.f32 %v756_v9, %v756_v9  ;;  %v435_v52 = vsub.f32 %v2299_v19, %v2415_v51 }
 0x12e   :  { %v569_v61 = vpop.permute.xlu1 %568  ;;  %1197 = vadd.xlane.f32.xlu0 %v2512_v1  ;;  %v573_v7 = vpop.permute.xlu0 %572  ;;  %v434_v54 = vsub.f32 %v2301_v22, %v2415_v51  ;;  %1562 = vpow2.f32 %v1087_v35  ;;  %v1010_v8 = vmul.f32 -0.02, %v946_v41  ;;  %v1091_v17 = vmul.f32 1.442695, %v1008_v10 }
 0x12f   :  { %v757_v37 = vsub.f32 %v569_v61, %v2410_v45  ;;  %1195 = vadd.xlane.f32.xlu1 %v2516_v14  ;;  %v947_v6 = vadd.f32 %v883_v0, %v819_v44  ;;  %v758_v42 = vsub.f32 %v573_v7, %v2410_v45  ;;  %v1093_v3 = vmul.f32 1.442695, %v1009_v49  ;;  %v2539_v38 = vpop.eup %1550 }
 0x130   :  { %1564 = vpow2.f32 %v1089_v15  ;;  %v948_v19 = vadd.f32 %v884_v20, %v820_v43  ;;  %v822_v44 = vmul.f32 %v431_v40, %v431_v40  ;;  %v824_v18 = vmul.f32 %v433_v16, %v433_v16 }
 0x131   :  { %v885_v13 = vmul.f32 %v757_v37, %v757_v37  ;;  %v1011_v55 = vmul.f32 -0.02, %v947_v6  ;;  %v886_v58 = vmul.f32 %v758_v42, %v758_v42  ;;  %v2542_v48 = vpop.eup %1552  ;;  %v826_v9 = vmul.f32 %v435_v52, %v435_v52 }
 0x132   :  { %v577_v63 = vpop.permute.xlu1 %576  ;;  %1201 = vadd.xlane.f32.xlu0 %v2527_v56  ;;  %v581_v12 = vpop.permute.xlu0 %580  ;;  %v436_v39 = vsub.f32 %v2307_v24, %v2415_v51  ;;  %1566 = vpow2.f32 %v1093_v3  ;;  %v1095_v7 = vmul.f32 1.442695, %v1010_v8  ;;  %v1012_v24 = vmul.f32 -0.02, %v948_v19 }
 0x133   :  { %v759_v53 = vsub.f32 %v577_v63, %v2410_v45  ;;  %1199 = vadd.xlane.f32.xlu1 %v2525_v46  ;;  %v949_v2 = vadd.f32 %v885_v13, %v821_v50  ;;  %v760_v57 = vsub.f32 %v581_v12, %v2410_v45  ;;  %v825_v50 = vmul.f32 %v434_v54, %v434_v54  ;;  %v2548_v35 = vpop.eup %1554 }
 0x134   :  { %v1097_v49 = vmul.f32 1.442695, %v1011_v55  ;;  %1568 = vpow2.f32 %v1091_v17  ;;  %v950_v15 = vadd.f32 %v886_v58, %v822_v44  ;;  %v437_v20 = vsub.f32 %v2305_v21, %v2415_v51 }
 0x135   :  { %v887_v22 = vmul.f32 %v759_v53, %v759_v53  ;;  %v1013_v41 = vmul.f32 -0.02, %v949_v2  ;;  %v888_v10 = vmul.f32 %v760_v57, %v760_v57  ;;  %v2552_v6 = vpop.eup %1556  ;;  %v827_v13 = vmul.f32 %v436_v39, %v436_v39 }
 0x136   :  { %v585_v0 = vpop.permute.xlu1 %584  ;;  %1205 = vadd.xlane.f32.xlu0 %v2539_v38  ;;  %v589_v61 = vpop.permute.xlu0 %588  ;;  %v438_v42 = vsub.f32 %v2313_v26, %v2415_v51  ;;  %1570 = vpow2.f32 %v1095_v7  ;;  %v1099_v26 = vmul.f32 1.442695, %v1012_v24  ;;  %v1014_v17 = vmul.f32 -0.02, %v950_v15 }
 0x137   :  { %v951_v43 = vadd.f32 %v887_v22, %v823_v60  ;;  %1203 = vadd.xlane.f32.xlu1 %v2542_v48  ;;  %v761_v40 = vsub.f32 %v585_v0, %v2410_v45  ;;  %v762_v37 = vsub.f32 %v589_v61, %v2410_v45  ;;  %1572 = vpow2.f32 %v1097_v49  ;;  %v2562_v53 = vpop.eup %1558 }
 0x138   :  { %v1101_v3 = vmul.f32 1.442695, %v1013_v41  ;;  %v952_v55 = vadd.f32 %v888_v10, %v824_v18  ;;  %v439_v58 = vsub.f32 %v2311_v23, %v2415_v51  ;;  %v829_v22 = vmul.f32 %v438_v42, %v438_v42 }
 0x139   :  { %v889_v16 = vmul.f32 %v761_v40, %v761_v40  ;;  %v1015_v54 = vmul.f32 -0.02, %v951_v43  ;;  %v890_v63 = vmul.f32 %v762_v37, %v762_v37  ;;  %v2564_v19 = vpop.eup %1560  ;;  %v441_v57 = vsub.f32 %v2317_v25, %v2415_v51 }
 0x13a   :  { %v593_v60 = vpop.permute.xlu1 %592  ;;  %1209 = vadd.xlane.f32.xlu0 %v2548_v35  ;;  %v597_v52 = vpop.permute.xlu0 %596  ;;  %v440_v44 = vsub.f32 %v2319_v28, %v2415_v51  ;;  %1574 = vpow2.f32 %v1101_v3  ;;  %v1103_v28 = vmul.f32 1.442695, %v1014_v17  ;;  %v1016_v40 = vmul.f32 -0.02, %v952_v55 }
 0x13b   :  { %v763_v12 = vsub.f32 %v593_v60, %v2410_v45  ;;  %1207 = vadd.xlane.f32.xlu1 %v2552_v6  ;;  %v953_v8 = vadd.f32 %v889_v16, %v825_v50  ;;  %v764_v21 = vsub.f32 %v597_v52, %v2410_v45  ;;  %v1105_v61 = vmul.f32 1.442695, %v1015_v54  ;;  %v2576_v23 = vpop.eup %1562 }
 0x13c   :  { %v954_v50 = vadd.f32 %v890_v63, %v826_v9  ;;  %1576 = vpow2.f32 %v1099_v26  ;;  %v828_v24 = vmul.f32 %v437_v20, %v437_v20  ;;  %v830_v9 = vmul.f32 %v439_v58, %v439_v58 }
 0x13d   :  { %v891_v2 = vmul.f32 %v763_v12, %v763_v12  ;;  %v1017_v43 = vmul.f32 -0.02, %v953_v8  ;;  %v892_v49 = vmul.f32 %v764_v21, %v764_v21  ;;  %v2578_v41 = vpop.eup %1564  ;;  %v832_v15 = vmul.f32 %v441_v57, %v441_v57 }
 0x13e   :  { %v601_v39 = vpop.permute.xlu1 %600  ;;  %1213 = vadd.xlane.f32.xlu0 %v2562_v53  ;;  %v605_v0 = vpop.permute.xlu0 %604  ;;  %v442_v10 = vsub.f32 %v2325_v30, %v2415_v51  ;;  %1578 = vpow2.f32 %v1105_v61  ;;  %v1018_v60 = vmul.f32 -0.02, %v954_v50  ;;  %v831_v8 = vmul.f32 %v440_v44, %v440_v44 }
 0x13f   :  { %v765_v18 = vsub.f32 %v601_v39, %v2410_v45  ;;  %v766_v7 = vsub.f32 %v605_v0, %v2410_v45  ;;  %1211 = vadd.xlane.f32.xlu1 %v2564_v19  ;;  %v955_v25 = vadd.f32 %v891_v2, %v827_v13  ;;  %v2584_v54 = vpop.eup %1566  ;;  %v1109_v63 = vmul.f32 1.442695, %v1017_v43 }
 0x140   :  { %v956_v20 = vadd.f32 %v892_v49, %v828_v24  ;;  %1580 = vpow2.f32 %v1103_v28  ;;  %v1107_v30 = vmul.f32 1.442695, %v1016_v40  ;;  %v443_v17 = vsub.f32 %v2323_v27, %v2415_v51 }
 0x141   :  { %v893_v37 = vmul.f32 %v765_v18, %v765_v18  ;;  %v894_v52 = vmul.f32 %v766_v7, %v766_v7  ;;  %v1019_v12 = vmul.f32 -0.02, %v955_v25  ;;  %v2588_v26 = vpop.eup %1568  ;;  %v833_v55 = vmul.f32 %v442_v10, %v442_v10 }
 0x142   :  { %v609_v42 = vpop.permute.xlu1 %608  ;;  %1217 = vadd.xlane.f32.xlu0 %v2578_v41  ;;  %v613_v16 = vpop.permute.xlu0 %612  ;;  %v444_v2 = vsub.f32 %v2331_v32, %v2415_v51  ;;  %v1111_v39 = vmul.f32 1.442695, %v1018_v60  ;;  %1582 = vpow2.f32 %v1109_v63  ;;  %v1020_v18 = vmul.f32 -0.02, %v956_v20 }
 0x143   :  { %v957_v13 = vadd.f32 %v893_v37, %v829_v22  ;;  %1215 = vadd.xlane.f32.xlu1 %v2576_v23  ;;  %v767_v3 = vsub.f32 %v609_v42, %v2410_v45  ;;  %v768_v21 = vsub.f32 %v613_v16, %v2410_v45  ;;  %v958_v0 = vadd.f32 %v894_v52, %v830_v9  ;;  %v2597_v50 = vpop.eup %1570 }
 0x144   :  { %v1113_v27 = vmul.f32 1.442695, %v1019_v12  ;;  %v2599_v43 = vpop.eup %1572  ;;  %1584 = vpow2.f32 %v1107_v30  ;;  %v445_v28 = vsub.f32 %v2329_v29, %v2415_v51  ;;  %v835_v40 = vmul.f32 %v444_v2, %v444_v2 }
 0x145   :  { %v895_v58 = vmul.f32 %v767_v3, %v767_v3  ;;  %v1021_v44 = vmul.f32 -0.02, %v957_v13  ;;  %v896_v32 = vmul.f32 %v768_v21, %v768_v21  ;;  %v447_v37 = vsub.f32 %v2335_v31, %v2415_v51 }
 0x146   :  { %v617_v22 = vpop.permute.xlu1 %616  ;;  %1221 = vadd.xlane.f32.xlu0 %v2584_v54  ;;  %v621_v57 = vpop.permute.xlu0 %620  ;;  %v446_v24 = vsub.f32 %v2337_v34, %v2415_v51  ;;  %1586 = vpow2.f32 %v1111_v39  ;;  %v1022_v16 = vmul.f32 -0.02, %v958_v0  ;;  %v1115_v29 = vmul.f32 1.442695, %v1020_v18 }
 0x147   :  { %v769_v61 = vsub.f32 %v617_v22, %v2410_v45  ;;  %1219 = vadd.xlane.f32.xlu1 %v2588_v26  ;;  %v959_v7 = vadd.f32 %v895_v58, %v831_v8  ;;  %v770_v49 = vsub.f32 %v621_v57, %v2410_v45  ;;  %v1117_v42 = vmul.f32 1.442695, %v1021_v44  ;;  %v2611_v63 = vpop.eup %1574 }
 0x148   :  { %1588 = vpow2.f32 %v1113_v27  ;;  %v960_v31 = vadd.f32 %v896_v32, %v832_v15  ;;  %v834_v8 = vmul.f32 %v443_v17, %v443_v17  ;;  %v836_v30 = vmul.f32 %v445_v28, %v445_v28  ;;  %v2941_v32 = vld [vmem:[#allocation14_spill] sm:$0xff]  ;;  %v2942_v28 = vld [vmem:[#allocation16_spill] sm:$0xff] }
 0x149   :  { %v897_v25 = vmul.f32 %v769_v61, %v769_v61  ;;  %v1023_v13 = vmul.f32 -0.02, %v959_v7  ;;  %v898_v12 = vmul.f32 %v770_v49, %v770_v49  ;;  %v2614_v3 = vpop.eup %1576  ;;  %v838_v21 = vmul.f32 %v447_v37, %v447_v37 }
 0x14a   :  { %v625_v9 = vpop.permute.xlu1 %624  ;;  %1225 = vadd.xlane.f32.xlu0 %v2599_v43  ;;  %v629_v10 = vpop.permute.xlu0 %628  ;;  %v448_v2 = vsub.f32 %v2343_v36, %v2415_v51  ;;  %1590 = vpow2.f32 %v1117_v42  ;;  %v1119_v57 = vmul.f32 1.442695, %v1022_v16  ;;  %v1024_v36 = vmul.f32 -0.02, %v960_v31 }
 0x14b   :  { %v771_v60 = vsub.f32 %v625_v9, %v2410_v45  ;;  %1223 = vadd.xlane.f32.xlu1 %v2597_v50  ;;  %v961_v52 = vadd.f32 %v897_v25, %v833_v55  ;;  %v772_v20 = vsub.f32 %v629_v10, %v2410_v45  ;;  %v837_v55 = vmul.f32 %v446_v24, %v446_v24  ;;  %v2620_v39 = vpop.eup %1578 }
 0x14c   :  { %v1121_v44 = vmul.f32 1.442695, %v1023_v13  ;;  %1592 = vpow2.f32 %v1115_v29  ;;  %v962_v27 = vadd.f32 %v898_v12, %v834_v8  ;;  %v449_v25 = vsub.f32 %v2941_v32, %v2415_v51 }
 0x14d   :  { %v899_v34 = vmul.f32 %v771_v60, %v771_v60  ;;  %v1025_v0 = vmul.f32 -0.02, %v961_v52  ;;  %v900_v18 = vmul.f32 %v772_v20, %v772_v20  ;;  %v2624_v7 = vpop.eup %1580  ;;  %v839_v49 = vmul.f32 %v448_v2, %v448_v2  ;;  %v2943_v2 = vld [vmem:[#allocation15_spill] sm:$0xff] }
 0x14e   :  { %v633_v58 = vpop.permute.xlu1 %632  ;;  %1229 = vadd.xlane.f32.xlu0 %v2611_v63  ;;  %v637_v22 = vpop.permute.xlu0 %636  ;;  %1594 = vpow2.f32 %v1119_v57  ;;  %v1123_v31 = vmul.f32 1.442695, %v1024_v36  ;;  %v1026_v12 = vmul.f32 -0.02, %v962_v27  ;;  %v2944_v57 = vld [vmem:[#allocation17_spill] sm:$0xff] }
 0x14f   :  { %v963_v15 = vadd.f32 %v899_v34, %v835_v40  ;;  %1227 = vadd.xlane.f32.xlu1 %v2614_v3  ;;  %v773_v17 = vsub.f32 %v633_v58, %v2410_v45  ;;  %v774_v61 = vsub.f32 %v637_v22, %v2410_v45  ;;  %v450_v40 = vsub.f32 %v2942_v28, %v2415_v51  ;;  %v2634_v52 = vpop.eup %1582 }
 0x150   :  { %1596 = vpow2.f32 %v1121_v44  ;;  %v1125_v60 = vmul.f32 1.442695, %v1025_v0  ;;  %v964_v34 = vadd.f32 %v900_v18, %v836_v30  ;;  %v451_v58 = vsub.f32 %v2943_v2, %v2415_v51  ;;  %v2945_v44 = vld [vmem:[#allocation18_spill] sm:$0xff] }
 0x151   :  { %v901_v37 = vmul.f32 %v773_v17, %v773_v17  ;;  %v1027_v10 = vmul.f32 -0.02, %v963_v15  ;;  %v902_v42 = vmul.f32 %v774_v61, %v774_v61  ;;  %v2636_v8 = vpop.eup %1584  ;;  %v841_v22 = vmul.f32 %v450_v40, %v450_v40 }
 0x152   :  { %v641_v24 = vpop.permute.xlu1 %640  ;;  %1233 = vadd.xlane.f32.xlu0 %v2620_v39  ;;  %v645_v9 = vpop.permute.xlu0 %644  ;;  %v453_v15 = vsub.f32 %v2944_v57, %v2415_v51  ;;  %1598 = vpow2.f32 %v1125_v60 }
 0x153   :  { %v775_v16 = vsub.f32 %v641_v24, %v2410_v45  ;;  %1231 = vadd.xlane.f32.xlu1 %v2624_v7  ;;  %v965_v29 = vadd.f32 %v901_v37, %v837_v55  ;;  %v776_v13 = vsub.f32 %v645_v9, %v2410_v45  ;;  %v452_v55 = vsub.f32 %v2945_v44, %v2415_v51  ;;  %v2648_v18 = vpop.eup %1586 }
 0x154   :  { %v1129_v61 = vmul.f32 1.442695, %v1027_v10  ;;  %v966_v36 = vadd.f32 %v902_v42, %v838_v21  ;;  %1600 = vpow2.f32 %v1123_v31  ;;  %v1127_v24 = vmul.f32 1.442695, %v1026_v12 }
 0x155   :  { %v903_v20 = vmul.f32 %v775_v16, %v775_v16  ;;  %v1029_v32 = vmul.f32 -0.02, %v965_v29  ;;  %v904_v40 = vmul.f32 %v776_v13, %v776_v13  ;;  %v2650_v37 = vpop.eup %1588  ;;  %v1028_v9 = vmul.f32 -0.02, %v964_v34 }
 0x156   :  { %v649_v0 = vpop.permute.xlu1 %648  ;;  %1237 = vadd.xlane.f32.xlu0 %v2634_v52  ;;  %v653_v17 = vpop.permute.xlu0 %652  ;;  %v840_v10 = vmul.f32 %v449_v25, %v449_v25  ;;  %v842_v21 = vmul.f32 %v451_v58, %v451_v58  ;;  %v844_v42 = vmul.f32 %v453_v15, %v453_v15  ;;  %1602 = vpow2.f32 %v1129_v61  ;;  %v2948_v15 = vld [vmem:[#allocation19_spill] sm:$0xff] }
 0x157   :  { %v777_v30 = vsub.f32 %v649_v0, %v2410_v45  ;;  %v778_v27 = vsub.f32 %v653_v17, %v2410_v45  ;;  %1235 = vadd.xlane.f32.xlu1 %v2636_v8  ;;  %v967_v28 = vadd.f32 %v903_v20, %v839_v49  ;;  %v1030_v44 = vmul.f32 -0.02, %v966_v36  ;;  %v2654_v49 = vpop.eup %1590  ;;  %v2949_v17 = vld [vmem:[#allocation20_spill] sm:$0xff]  ;;  %v2950_v36 = vld [vmem:[#allocation22_spill] sm:$0xff] }
 0x158   :  { %2946 = vst [vmem:[#allocation10_spill] sm:$0xff] %v2654_v49  ;;  %v1133_v29 = vmul.f32 1.442695, %v1029_v32  ;;  %v968_v31 = vadd.f32 %v904_v40, %v840_v10  ;;  %v843_v25 = vmul.f32 %v452_v55, %v452_v55  ;;  %1604 = vpow2.f32 %v1127_v24 }
 0x159   :  { %v905_v16 = vmul.f32 %v777_v30, %v777_v30  ;;  %v906_v60 = vmul.f32 %v778_v27, %v778_v27  ;;  %v1031_v13 = vmul.f32 -0.02, %v967_v28  ;;  %v1131_v34 = vmul.f32 1.442695, %v1028_v9  ;;  %v2658_v58 = vpop.eup %1592 }
 0x15a   :  { %v657_v2 = vpop.permute.xlu1 %656  ;;  %1241 = vadd.xlane.f32.xlu0 %v2650_v37  ;;  %v661_v57 = vpop.permute.xlu0 %660  ;;  %2947 = vst [vmem:[#allocation9_spill] sm:$0xff] %v2658_v58  ;;  %v454_v61 = vsub.f32 %v2949_v17, %v2415_v51  ;;  %v456_v30 = vsub.f32 %v2950_v36, %v2415_v51  ;;  %v1135_v28 = vmul.f32 1.442695, %v1030_v44  ;;  %1606 = vpow2.f32 %v1133_v29 }
 0x15b   :  { %v969_v0 = vadd.f32 %v905_v16, %v841_v22  ;;  %1239 = vadd.xlane.f32.xlu1 %v2648_v18  ;;  %v779_v12 = vsub.f32 %v657_v2, %v2410_v45  ;;  %v780_v20 = vsub.f32 %v661_v57, %v2410_v45  ;;  %v455_v22 = vsub.f32 %v2948_v15, %v2415_v51  ;;  %v2669_v16 = vpop.eup %1594 }
 0x15c   :  { %v970_v24 = vadd.f32 %v906_v60, %v842_v21  ;;  %2951 = vst [vmem:[#allocation11_spill] sm:$0xff] %v2669_v16  ;;  %v1137_v10 = vmul.f32 1.442695, %v1031_v13  ;;  %v1032_v2 = vmul.f32 -0.02, %v968_v31  ;;  %1608 = vpow2.f32 %v1131_v34  ;;  %v2952_v21 = vld [vmem:[#allocation21_spill] sm:$0xff] }
 0x15d   :  { %v907_v27 = vmul.f32 %v779_v12, %v779_v12  ;;  %v1033_v40 = vmul.f32 -0.02, %v969_v0  ;;  %v2671_v15 = vpop.eup %1596  ;;  %v908_v12 = vmul.f32 %v780_v20, %v780_v20  ;;  %v845_v44 = vmul.f32 %v454_v61, %v454_v61 }
 0x15e   :  { %v665_v32 = vpop.permute.xlu1 %664  ;;  %1245 = vadd.xlane.f32.xlu0 %v2654_v49  ;;  %v669_v55 = vpop.permute.xlu0 %668  ;;  %v457_v0 = vsub.f32 %v2952_v21, %v2415_v51  ;;  %v847_v60 = vmul.f32 %v456_v30, %v456_v30  ;;  %1610 = vpow2.f32 %v1135_v28  ;;  %v1034_v31 = vmul.f32 -0.02, %v970_v24 }
 0x15f   :  { %v781_v9 = vsub.f32 %v665_v32, %v2410_v45  ;;  %1243 = vadd.xlane.f32.xlu1 %v2658_v58  ;;  %v971_v57 = vadd.f32 %v907_v27, %v843_v25  ;;  %v782_v36 = vsub.f32 %v669_v55, %v2410_v45  ;;  %v2953_v32 = vld [vmem:[#allocation23_spill] sm:$0xff]  ;;  %v1141_v13 = vmul.f32 1.442695, %v1033_v40  ;;  %v2681_v27 = vpop.eup %1598 }
 0x160   :  { %v459_v58 = vsub.f32 %v2953_v32, %v2415_v51  ;;  %1612 = vpow2.f32 %v1137_v10  ;;  %v1139_v34 = vmul.f32 1.442695, %v1032_v2  ;;  %2954 = vst [vmem:[#allocation12_spill] sm:$0xff] %v2681_v27  ;;  %v972_v30 = vadd.f32 %v908_v12, %v844_v42  ;;  %v2694_v10 = vld [vmem:[%s2881_s1] ss:$0 sm:$0xff]  ;;  %v2956_v42 = vld [vmem:[#allocation24_spill] sm:$0xff] }
 0x161   :  { %v909_v17 = vmul.f32 %v781_v9, %v781_v9  ;;  %v1035_v20 = vmul.f32 -0.02, %v971_v57  ;;  %v910_v55 = vmul.f32 %v782_v36, %v782_v36  ;;  %v2686_v9 = vld [vmem:[%s2882_s2] ss:$0 sm:$0xff]  ;;  %v2689_v40 = vpop.eup %1600  ;;  %v458_v2 = vsub.f32 %v2956_v42, %v2694_v10  ;;  %s1810_s1 = smov [#allocation2]  }
 0x162   :  { %v673_v49 = vpop.permute.xlu1 %672  ;;  %1249 = vadd.xlane.f32.xlu0 %v2671_v15  ;;  %v677_v29 = vpop.permute.xlu0 %676  ;;  %2955 = vst [vmem:[#allocation13_spill] sm:$0xff] %v2689_v40  ;;  %v850_v24 = vmul.f32 %v459_v58, %v459_v58  ;;  %1614 = vpow2.f32 %v1141_v13  ;;  %v2960_v13 = vld [vmem:[#allocation25_spill] sm:$0xff]  ;;  %s1506_s2 = sshll.u32 %s1810_s1, 4  ;;  %s1507_s2 = int_to_ptr.vmem [resolvable:$true] %s1506_s2 }
 0x163   :  { %v783_v25 = vsub.f32 %v673_v49, %v2410_v45  ;;  %1247 = vadd.xlane.f32.xlu1 %v2669_v16  ;;  %v973_v61 = vadd.f32 %v909_v17, %v845_v44  ;;  %v784_v28 = vsub.f32 %v677_v29, %v2686_v9  ;;  %v846_v45 = vmul.f32 %v455_v22, %v455_v22  ;;  %v2957_v17 = vld [vmem:[#allocation26_spill] sm:$0xff]  ;;  %v2702_v58 = vpop.eup %1602  ;;  %s1786_s12 = scalar_lea.vmem %s1507_s2, 8192  ;;  %p1791_p1 = scmp.lt.s32.totalorder %s1507_s2, %s1507_s2 }
 0x164   :  { %v848_v49 = vmul.f32 %v457_v0, %v457_v0  ;;  %v460_v36 = vsub.f32 %v2957_v17, %v2694_v10  ;;  %v1143_v44 = vmul.f32 1.442695, %v1034_v31  ;;  %2958 = vst [vmem:[#allocation14_spill] sm:$0xff] %v2702_v58  ;;  %v1145_v21 = vmul.f32 1.442695, %v1035_v20  ;;  %p1787_p0 = scmp.ne.s32.totalorder %s1507_s2, %s1786_s12  ;;  %p1792_p2 = scmp.lt.s32.totalorder %s1786_s12, %s1786_s12 }
 0x165   :  { %v911_v51 = vmul.f32 %v783_v25, %v783_v25  ;;  %v1037_v0 = vmul.f32 -0.02, %v973_v61  ;;  %1616 = vpow2.f32 %v1139_v34  ;;  %v1036_v25 = vmul.f32 -0.02, %v972_v30  ;;  %v2706_v16 = vpop.eup %1604 }
 0x166   :  { %v681_v57 = vpop.permute.xlu1 %680  ;;  %1253 = vadd.xlane.f32.xlu0 %v2681_v27  ;;  %v685_v12 = vpop.permute.xlu0 %684  ;;  %v974_v42 = vadd.f32 %v910_v55, %v846_v45  ;;  %v912_v27 = vmul.f32 %v784_v28, %v784_v28  ;;  %2959 = vst [vmem:[#allocation16_spill] sm:$0xff] %v2706_v16  ;;  %v849_v17 = vmul.f32 %v458_v2, %v458_v2  ;;  %1618 = vpow2.f32 %v1143_v44  ;;  %v2961_v44 = vld [vmem:[#allocation27_spill] sm:$0xff]  ;;  %p1793_p3 = por %p1792_p2, %p1791_p1 }
 0x167   :  { %v975_v22 = vadd.f32 %v911_v51, %v847_v60  ;;  %1251 = vadd.xlane.f32.xlu1 %v2689_v40  ;;  %v785_v32 = vsub.f32 %v681_v57, %v2686_v9  ;;  %v786_v29 = vsub.f32 %v685_v12, %v2686_v9  ;;  %v461_v60 = vsub.f32 %v2960_v13, %v2694_v10  ;;  %v2714_v45 = vpop.eup %1606 }
 0x168   :  { %v851_v30 = vmul.f32 %v460_v36, %v460_v36  ;;  %1620 = vpow2.f32 %v1145_v21  ;;  %v1149_v55 = vmul.f32 1.442695, %v1037_v0  ;;  %v1147_v2 = vmul.f32 1.442695, %v1036_v25  ;;  %p1794_p4 = pnand %p1793_p3, %p1787_p0 }
 0x169   :  { %v913_v31 = vmul.f32 %v785_v32, %v785_v32  ;;  %v914_v51 = vmul.f32 %v786_v29, %v786_v29  ;;  %v1039_v61 = vmul.f32 -0.02, %v975_v22  ;;  %v1038_v12 = vmul.f32 -0.02, %v974_v42  ;;  %v2716_v13 = vpop.eup %1608 }
 0x16a   :  { %v689_v40 = vpop.permute.xlu1 %688  ;;  %1257 = vadd.xlane.f32.xlu0 %v2702_v58  ;;  %v693_v20 = vpop.permute.xlu0 %692  ;;  %v976_v32 = vadd.f32 %v912_v27, %v848_v49  ;;  %v463_v22 = vsub.f32 %v2961_v44, %v2694_v10  ;;  %v852_v49 = vmul.f32 %v461_v60, %v461_v60  ;;  %1622 = vpow2.f32 %v1149_v55 }
 0x16b   :  { %v787_v57 = vsub.f32 %v689_v40, %v2686_v9  ;;  %v788_v34 = vsub.f32 %v693_v20, %v2686_v9  ;;  %1255 = vadd.xlane.f32.xlu1 %v2706_v16  ;;  %v977_v28 = vadd.f32 %v913_v31, %v849_v17  ;;  %v2962_v40 = vld [vmem:[#allocation28_spill] sm:$0xff]  ;;  %v978_v58 = vadd.f32 %v914_v51, %v850_v24  ;;  %v2725_v27 = vpop.eup %1610 }
 0x16c   :  { %v462_v20 = vsub.f32 %v2962_v40, %v2694_v10  ;;  %v1153_v21 = vmul.f32 1.442695, %v1039_v61  ;;  %2963 = vst [vmem:[#allocation15_spill] sm:$0xff] %v2725_v27  ;;  %1624 = vpow2.f32 %v1147_v2  ;;  %v1151_v24 = vmul.f32 1.442695, %v1038_v12 }
 0x16d   :  { %v915_v29 = vmul.f32 %v787_v57, %v787_v57  ;;  %v916_v17 = vmul.f32 %v788_v34, %v788_v34  ;;  %v1041_v42 = vmul.f32 -0.02, %v977_v28  ;;  %v2728_v57 = vpop.eup %1612  ;;  %v1040_v51 = vmul.f32 -0.02, %v976_v32  ;;  %v2965_v34 = vld [vmem:[#allocation30_spill] sm:$0xff] }
 0x16e   :  { %v697_v16 = vpop.permute.xlu1 %696  ;;  %1261 = vadd.xlane.f32.xlu0 %v2714_v45  ;;  %v701_v36 = vpop.permute.xlu0 %700  ;;  %2964 = vst [vmem:[#allocation17_spill] sm:$0xff] %v2728_v57  ;;  %v853_v61 = vmul.f32 %v462_v20, %v462_v20  ;;  %v854_v60 = vmul.f32 %v463_v22, %v463_v22  ;;  %1626 = vpow2.f32 %v1153_v21 }
 0x16f   :  { %v979_v0 = vadd.f32 %v915_v29, %v851_v30  ;;  %v789_v25 = vsub.f32 %v697_v16, %v2686_v9  ;;  %1259 = vadd.xlane.f32.xlu1 %v2716_v13  ;;  %v790_v31 = vsub.f32 %v701_v36, %v2686_v9  ;;  %v464_v30 = vsub.f32 %v2965_v34, %v2694_v10  ;;  %v2734_v36 = vpop.eup %1614 }
 0x170   :  { %v1042_v16 = vmul.f32 -0.02, %v978_v58  ;;  %v980_v28 = vadd.f32 %v916_v17, %v852_v49  ;;  %2966 = vst [vmem:[#allocation18_spill] sm:$0xff] %v2734_v36  ;;  %v1157_v2 = vmul.f32 1.442695, %v1041_v42  ;;  %1628 = vpow2.f32 %v1151_v24 }
 0x171   :  { %v917_v44 = vmul.f32 %v789_v25, %v789_v25  ;;  %v1043_v55 = vmul.f32 -0.02, %v979_v0  ;;  %v918_v32 = vmul.f32 %v790_v31, %v790_v31  ;;  %v2967_v25 = vld [vmem:[#allocation29_spill] sm:$0xff]  ;;  %v1155_v34 = vmul.f32 1.442695, %v1040_v51 }
 0x172   :  { %v705_v29 = vpop.permute.xlu1 %704  ;;  %1265 = vadd.xlane.f32.xlu0 %v2728_v57  ;;  %v709_v40 = vpop.permute.xlu0 %708  ;;  %v465_v58 = vsub.f32 %v2967_v25, %v2694_v10  ;;  %v855_v21 = vmul.f32 %v464_v30, %v464_v30  ;;  %v2969_v0 = vld [vmem:[#allocation5_spill] sm:$0xff]  ;;  %v1159_v49 = vmul.f32 1.442695, %v1042_v16  ;;  %1630 = vpow2.f32 %v1157_v2 }
 0x173   :  { %1263 = vadd.xlane.f32.xlu1 %v2725_v27  ;;  %v981_v12 = vadd.f32 %v917_v44, %v853_v61  ;;  %v791_v20 = vsub.f32 %v705_v29, %v2686_v9  ;;  %v792_v57 = vsub.f32 %v709_v40, %v2686_v9  ;;  %v2740_v22 = vpop.eup %1616  ;;  %v466_v17 = vsub.f32 %v2969_v0, %v2694_v10 }
 0x174   :  { %2968 = vst [vmem:[#allocation19_spill] sm:$0xff] %v2740_v22  ;;  %v1161_v44 = vmul.f32 1.442695, %v1043_v55  ;;  %v1044_v61 = vmul.f32 -0.02, %v980_v28  ;;  %v2747_v24 = vpop.eup %1618  ;;  %v982_v30 = vadd.f32 %v918_v32, %v854_v60  ;;  %1632 = vpow2.f32 %v1155_v34  ;;  %v2971_v28 = vld [vmem:[#allocation7_spill] sm:$0xff] }
 0x175   :  { %v919_v27 = vmul.f32 %v791_v20, %v791_v20  ;;  %v1045_v51 = vmul.f32 -0.02, %v981_v12  ;;  %v2749_v25 = vpop.eup %1620  ;;  %v920_v16 = vmul.f32 %v792_v57, %v792_v57  ;;  %v857_v55 = vmul.f32 %v466_v17, %v466_v17  ;;  %v2972_v60 = vld [vmem:[#allocation6_spill] sm:$0xff] }
 0x176   :  { %v713_v42 = vpop.permute.xlu1 %712  ;;  %1269 = vadd.xlane.f32.xlu0 %v2734_v36  ;;  %v717_v31 = vpop.permute.xlu0 %716  ;;  %2970 = vst [vmem:[#allocation20_spill] sm:$0xff] %v2749_v25  ;;  %v856_v36 = vmul.f32 %v465_v58, %v465_v58  ;;  %1634 = vpow2.f32 %v1159_v49  ;;  %v1163_v12 = vmul.f32 1.442695, %v1044_v61  ;;  %v1046_v58 = vmul.f32 -0.02, %v982_v30 }
 0x177   :  { %v793_v29 = vsub.f32 %v713_v42, %v2686_v9  ;;  %1267 = vadd.xlane.f32.xlu1 %v2740_v22  ;;  %v983_v40 = vadd.f32 %v919_v27, %v855_v21  ;;  %v794_v0 = vsub.f32 %v717_v31, %v2686_v9  ;;  %v468_v42 = vsub.f32 %v2971_v28, %v2694_v10  ;;  %v2759_v17 = vpop.eup %1622 }
 0x178   :  { %v467_v27 = vsub.f32 %v2972_v60, %v2694_v10  ;;  %1636 = vpow2.f32 %v1161_v44  ;;  %v1165_v32 = vmul.f32 1.442695, %v1045_v51  ;;  %v984_v49 = vadd.f32 %v920_v16, %v856_v36 }
 0x179   :  { %v921_v20 = vmul.f32 %v793_v29, %v793_v29  ;;  %v1047_v34 = vmul.f32 -0.02, %v983_v40  ;;  %v922_v31 = vmul.f32 %v794_v0, %v794_v0  ;;  %v859_v60 = vmul.f32 %v468_v42, %v468_v42 }
 0x17a   :  { %v721_v22 = vpop.permute.xlu1 %720  ;;  %1273 = vadd.xlane.f32.xlu0 %v2749_v25  ;;  %v725_v2 = vpop.permute.xlu0 %724  ;;  %v858_v44 = vmul.f32 %v467_v27, %v467_v27  ;;  %1638 = vpow2.f32 %v1163_v12  ;;  %v1167_v16 = vmul.f32 1.442695, %v1046_v58 }
 0x17b   :  { %v795_v57 = vsub.f32 %v721_v22, %v2686_v9  ;;  %1271 = vadd.xlane.f32.xlu1 %v2747_v24  ;;  %v985_v21 = vadd.f32 %v921_v20, %v857_v55  ;;  %v796_v28 = vsub.f32 %v725_v2, %v2686_v9  ;;  %v2762_v25 = vpop.eup %1624  ;;  %v2973_v22 = vld [vmem:[#allocation8_spill] sm:$0xff]  ;;  %1640 = vpow2.f32 %v1165_v32 }
 0x17c   :  { %v469_v61 = vsub.f32 %v2973_v22, %v2694_v10  ;;  %v2768_v51 = vpop.eup %1626  ;;  %v1169_v36 = vmul.f32 1.442695, %v1047_v34  ;;  %v1048_v9 = vmul.f32 -0.02, %v984_v49  ;;  %v986_v20 = vadd.f32 %v922_v31, %v858_v44 }
 0x17d   :  { %v923_v29 = vmul.f32 %v795_v57, %v795_v57  ;;  %v1049_v30 = vmul.f32 -0.02, %v985_v21  ;;  %v924_v0 = vmul.f32 %v796_v28, %v796_v28  ;;  %v2770_v55 = vpop.eup %1628 }
 0x17e   :  { %1277 = vadd.xlane.f32.xlu0 %v2759_v17  ;;  %v860_v42 = vmul.f32 %v469_v61, %v469_v61  ;;  %1642 = vpow2.f32 %v1169_v36  ;;  %v1171_v12 = vmul.f32 1.442695, %v1048_v9  ;;  %v1050_v57 = vmul.f32 -0.02, %v986_v20 }
 0x17f   :  { %1275 = vadd.xlane.f32.xlu1 %v2762_v25  ;;  %v987_v40 = vadd.f32 %v923_v29, %v859_v60  ;;  %v1173_v10 = vmul.f32 1.442695, %v1049_v30  ;;  %v2774_v27 = vpop.eup %1630  ;;  %1644 = vpow2.f32 %v1167_v16 }
 0x180   :  { %v988_v32 = vadd.f32 %v924_v0, %v860_v42  ;;  %v1175_v31 = vmul.f32 1.442695, %v1050_v57 }
 0x181   :  { %v1051_v2 = vmul.f32 -0.02, %v987_v40  ;;  %v2776_v58 = vpop.eup %1632  ;;  %1646 = vpow2.f32 %v1173_v10 }
 0x182   :  { %1281 = vadd.xlane.f32.xlu0 %v2768_v51  ;;  %1648 = vpow2.f32 %v1171_v12  ;;  %v1052_v29 = vmul.f32 -0.02, %v988_v32 }
 0x183   :  { %1279 = vadd.xlane.f32.xlu1 %v2770_v55  ;;  %v2779_v34 = vpop.eup %1634  ;;  %v1177_v49 = vmul.f32 1.442695, %v1051_v2 }
 0x184   :  { %v1179_v44 = vmul.f32 1.442695, %v1052_v29 }
 0x185   :  { %v2782_v21 = vpop.eup %1636  ;;  %1650 = vpow2.f32 %v1177_v49 }
 0x186   :  { %1285 = vadd.xlane.f32.xlu0 %v2774_v27  ;;  %1652 = vpow2.f32 %v1175_v31 }
 0x187   :  { %1283 = vadd.xlane.f32.xlu1 %v2776_v58  ;;  %v2786_v28 = vpop.eup %1638  ;;  %1654 = vpow2.f32 %v1179_v44 }
 0x188   :  { %v2788_v60 = vpop.eup %1640 }
 0x18a   :  { %1289 = vadd.xlane.f32.xlu0 %v2782_v21 }
 0x18b   :  { %1287 = vadd.xlane.f32.xlu1 %v2779_v34  ;;  %v2792_v22 = vpop.eup %1642 }
 0x18c   :  { %v2794_v61 = vpop.eup %1644 }
 0x18e   :  { %1293 = vadd.xlane.f32.xlu0 %v2788_v60  ;;  %v2798_v36 = vpop.eup %1646 }
 0x18f   :  { %1291 = vadd.xlane.f32.xlu1 %v2786_v28  ;;  %v2800_v30 = vpop.eup %1648 }
 0x192   :  { %1297 = vadd.xlane.f32.xlu0 %v2792_v22  ;;  %v2804_v40 = vpop.eup %1650 }
 0x193   :  { %1295 = vadd.xlane.f32.xlu1 %v2794_v61  ;;  %v2806_v16 = vpop.eup %1652 }
 0x194   :  { %v2810_v9 = vpop.eup %1654 }
 0x196   :  { %1301 = vadd.xlane.f32.xlu0 %v2798_v36 }
 0x197   :  { %1299 = vadd.xlane.f32.xlu1 %v2800_v30 }
 0x19a   :  { %1305 = vadd.xlane.f32.xlu0 %v2804_v40 }
 0x19b   :  { %1303 = vadd.xlane.f32.xlu1 %v2806_v16 }
 0x19f   :  { %1307 = vadd.xlane.f32.xlu1 %v2810_v9 }
 0x1a7   :  { %v1184_v20 = vpop.xlane.xlu0 %1183 }
 0x1a8   :  { %1656 = vrcp.f32 %v1184_v20 }
 0x1ab   :  { %v1186_v0 = vpop.xlane.xlu0 %1185 }
 0x1ac   :  { %1658 = vrcp.f32 %v1186_v0  ;;  %v1182_v42 = vpop.xlane.xlu1 %1181 }
 0x1ad   :  { %1660 = vrcp.f32 %v1182_v42 }
 0x1af   :  { %v1190_v10 = vpop.xlane.xlu0 %1189 }
 0x1b0   :  { %1662 = vrcp.f32 %v1190_v10  ;;  %v1188_v2 = vpop.xlane.xlu1 %1187 }
 0x1b1   :  { %1664 = vrcp.f32 %v1188_v2 }
 0x1b3   :  { %v1194_v12 = vpop.xlane.xlu0 %1193 }
 0x1b4   :  { %1666 = vrcp.f32 %v1194_v12  ;;  %v1192_v57 = vpop.xlane.xlu1 %1191 }
 0x1b5   :  { %v1657_v32 = vpop.eup %1656  ;;  %1668 = vrcp.f32 %v1192_v57 }
 0x1b6   :  { %v1374_v49 = vmul.f32 %v1657_v32, %v2470_v4 }
 0x1b7   :  { %v1198_v31 = vpop.xlane.xlu0 %1197 }
 0x1b8   :  { %1438 = vst [vmem:[#allocation2 + $0x8] sm:$0xff] %v1374_v49  ;;  %1670 = vrcp.f32 %v1198_v31  ;;  %v1196_v29 = vpop.xlane.xlu1 %1195 }
 0x1b9   :  { %v1659_v44 = vpop.eup %1658  ;;  %1672 = vrcp.f32 %v1196_v29 }
 0x1ba   :  { %v1661_v20 = vpop.eup %1660  ;;  %v1375_v0 = vmul.f32 %v1659_v44, %v2476_v62 }
 0x1bb   :  { %v1373_v42 = vmul.f32 %v1661_v20, %v2480_v59  ;;  %v1202_v10 = vpop.xlane.xlu0 %1201 }
 0x1bc   :  { %1439 = vst [vmem:[#allocation2 + $0x10] sm:$0xff] %v1375_v0  ;;  %1674 = vrcp.f32 %v1202_v10  ;;  %v1200_v2 = vpop.xlane.xlu1 %1199 }
 0x1bd   :  { %v1663_v12 = vpop.eup %1662  ;;  %1437 = vst [vmem:[#allocation2] sm:$0xff] %v1373_v42  ;;  %1676 = vrcp.f32 %v1200_v2 }
 0x1be   :  { %v1665_v57 = vpop.eup %1664  ;;  %v1377_v4 = vmul.f32 %v1663_v12, %v2490_v33 }
 0x1bf   :  { %v1376_v32 = vmul.f32 %v1665_v57, %v2492_v5  ;;  %v1206_v49 = vpop.xlane.xlu0 %1205 }
 0x1c0   :  { %1441 = vst [vmem:[#allocation2 + $0x20] sm:$0xff] %v1377_v4  ;;  %1678 = vrcp.f32 %v1206_v49  ;;  %v1204_v31 = vpop.xlane.xlu1 %1203 }
 0x1c1   :  { %v1667_v29 = vpop.eup %1666  ;;  %1440 = vst [vmem:[#allocation2 + $0x18] sm:$0xff] %v1376_v32  ;;  %1680 = vrcp.f32 %v1204_v31 }
 0x1c2   :  { %v1669_v62 = vpop.eup %1668  ;;  %v1379_v59 = vmul.f32 %v1667_v29, %v2506_v47 }
 0x1c3   :  { %v1378_v44 = vmul.f32 %v1669_v62, %v2504_v11  ;;  %v1210_v20 = vpop.xlane.xlu0 %1209 }
 0x1c4   :  { %1443 = vst [vmem:[#allocation2 + $0x30] sm:$0xff] %v1379_v59  ;;  %1682 = vrcp.f32 %v1210_v20  ;;  %v1208_v0 = vpop.xlane.xlu1 %1207 }
 0x1c5   :  { %v1671_v42 = vpop.eup %1670  ;;  %1442 = vst [vmem:[#allocation2 + $0x28] sm:$0xff] %v1378_v44  ;;  %1684 = vrcp.f32 %v1208_v0 }
 0x1c6   :  { %v1673_v33 = vpop.eup %1672  ;;  %v1381_v5 = vmul.f32 %v1671_v42, %v2512_v1 }
 0x1c7   :  { %v1380_v10 = vmul.f32 %v1673_v33, %v2516_v14  ;;  %v1214_v2 = vpop.xlane.xlu0 %1213 }
 0x1c8   :  { %1445 = vst [vmem:[#allocation2 + $0x40] sm:$0xff] %v1381_v5  ;;  %1686 = vrcp.f32 %v1214_v2  ;;  %v1212_v12 = vpop.xlane.xlu1 %1211 }
 0x1c9   :  { %v1675_v57 = vpop.eup %1674  ;;  %1444 = vst [vmem:[#allocation2 + $0x38] sm:$0xff] %v1380_v10  ;;  %1688 = vrcp.f32 %v1212_v12 }
 0x1ca   :  { %v1677_v11 = vpop.eup %1676  ;;  %v1383_v47 = vmul.f32 %v1675_v57, %v2527_v56 }
 0x1cb   :  { %v1382_v4 = vmul.f32 %v1677_v11, %v2525_v46  ;;  %v1218_v32 = vpop.xlane.xlu0 %1217 }
 0x1cc   :  { %1447 = vst [vmem:[#allocation2 + $0x50] sm:$0xff] %v1383_v47  ;;  %1690 = vrcp.f32 %v1218_v32  ;;  %v1216_v49 = vpop.xlane.xlu1 %1215 }
 0x1cd   :  { %v1679_v31 = vpop.eup %1678  ;;  %1446 = vst [vmem:[#allocation2 + $0x48] sm:$0xff] %v1382_v4  ;;  %1692 = vrcp.f32 %v1216_v49 }
 0x1ce   :  { %v1681_v1 = vpop.eup %1680  ;;  %v1385_v14 = vmul.f32 %v1679_v31, %v2539_v38 }
 0x1cf   :  { %v1384_v29 = vmul.f32 %v1681_v1, %v2542_v48  ;;  %v1222_v62 = vpop.xlane.xlu0 %1221 }
 0x1d0   :  { %1449 = vst [vmem:[#allocation2 + $0x60] sm:$0xff] %v1385_v14  ;;  %1694 = vrcp.f32 %v1222_v62  ;;  %v1220_v59 = vpop.xlane.xlu1 %1219 }
 0x1d1   :  { %v1683_v44 = vpop.eup %1682  ;;  %1448 = vst [vmem:[#allocation2 + $0x58] sm:$0xff] %v1384_v29  ;;  %1696 = vrcp.f32 %v1220_v59 }
 0x1d2   :  { %v1685_v46 = vpop.eup %1684  ;;  %v1387_v56 = vmul.f32 %v1683_v44, %v2548_v35 }
 0x1d3   :  { %v1386_v20 = vmul.f32 %v1685_v46, %v2552_v6  ;;  %v1226_v0 = vpop.xlane.xlu0 %1225 }
 0x1d4   :  { %1451 = vst [vmem:[#allocation2 + $0x70] sm:$0xff] %v1387_v56  ;;  %1698 = vrcp.f32 %v1226_v0  ;;  %v1224_v42 = vpop.xlane.xlu1 %1223 }
 0x1d5   :  { %v1687_v33 = vpop.eup %1686  ;;  %1450 = vst [vmem:[#allocation2 + $0x68] sm:$0xff] %v1386_v20  ;;  %1700 = vrcp.f32 %v1224_v42 }
 0x1d6   :  { %v1689_v38 = vpop.eup %1688  ;;  %v1389_v48 = vmul.f32 %v1687_v33, %v2562_v53 }
 0x1d7   :  { %v1388_v5 = vmul.f32 %v1689_v38, %v2564_v19  ;;  %v1230_v10 = vpop.xlane.xlu0 %1229 }
 0x1d8   :  { %1453 = vst [vmem:[#allocation2 + $0x80] sm:$0xff] %v1389_v48  ;;  %1702 = vrcp.f32 %v1230_v10  ;;  %v1228_v2 = vpop.xlane.xlu1 %1227 }
 0x1d9   :  { %v1691_v12 = vpop.eup %1690  ;;  %1452 = vst [vmem:[#allocation2 + $0x78] sm:$0xff] %v1388_v5  ;;  %1704 = vrcp.f32 %v1228_v2 }
 0x1da   :  { %v1693_v35 = vpop.eup %1692  ;;  %v1391_v6 = vmul.f32 %v1691_v12, %v2578_v41 }
 0x1db   :  { %v1390_v57 = vmul.f32 %v1693_v35, %v2576_v23  ;;  %v1234_v11 = vpop.xlane.xlu0 %1233 }
 0x1dc   :  { %1455 = vst [vmem:[#allocation2 + $0x90] sm:$0xff] %v1391_v6  ;;  %1706 = vrcp.f32 %v1234_v11  ;;  %v1232_v47 = vpop.xlane.xlu1 %1231 }
 0x1dd   :  { %v1695_v4 = vpop.eup %1694  ;;  %1454 = vst [vmem:[#allocation2 + $0x88] sm:$0xff] %v1390_v57  ;;  %1708 = vrcp.f32 %v1232_v47  ;;  %v2975_v47 = vld [vmem:[#allocation9_spill] sm:$0xff] }
 0x1de   :  { %v1697_v53 = vpop.eup %1696  ;;  %v1393_v19 = vmul.f32 %v1695_v4, %v2584_v54 }
 0x1df   :  { %v1392_v32 = vmul.f32 %v1697_v53, %v2588_v26  ;;  %v1238_v49 = vpop.xlane.xlu0 %1237 }
 0x1e0   :  { %1457 = vst [vmem:[#allocation2 + $0xa0] sm:$0xff] %v1393_v19  ;;  %1710 = vrcp.f32 %v1238_v49  ;;  %v1236_v31 = vpop.xlane.xlu1 %1235  ;;  %v2976_v49 = vld [vmem:[#allocation11_spill] sm:$0xff] }
 0x1e1   :  { %v1699_v1 = vpop.eup %1698  ;;  %1456 = vst [vmem:[#allocation2 + $0x98] sm:$0xff] %v1392_v32  ;;  %1712 = vrcp.f32 %v1236_v31 }
 0x1e2   :  { %v1701_v23 = vpop.eup %1700  ;;  %v1395_v41 = vmul.f32 %v1699_v1, %v2599_v43 }
 0x1e3   :  { %v1394_v14 = vmul.f32 %v1701_v23, %v2597_v50  ;;  %v1242_v29 = vpop.xlane.xlu0 %1241 }
 0x1e4   :  { %1459 = vst [vmem:[#allocation2 + $0xb0] sm:$0xff] %v1395_v41  ;;  %1714 = vrcp.f32 %v1242_v29  ;;  %v1240_v62 = vpop.xlane.xlu1 %1239  ;;  %v2977_v29 = vld [vmem:[#allocation12_spill] sm:$0xff] }
 0x1e5   :  { %v1703_v59 = vpop.eup %1702  ;;  %1458 = vst [vmem:[#allocation2 + $0xa8] sm:$0xff] %v1394_v14  ;;  %1716 = vrcp.f32 %v1240_v62 }
 0x1e6   :  { %v1705_v54 = vpop.eup %1704  ;;  %v1397_v26 = vmul.f32 %v1703_v59, %v2611_v63  ;;  %v2978_v59 = vld [vmem:[#allocation13_spill] sm:$0xff] }
 0x1e7   :  { %v1396_v44 = vmul.f32 %v1705_v54, %v2614_v3  ;;  %v1246_v46 = vpop.xlane.xlu0 %1245 }
 0x1e8   :  { %1461 = vst [vmem:[#allocation2 + $0xc0] sm:$0xff] %v1397_v26  ;;  %1718 = vrcp.f32 %v1246_v46  ;;  %v1244_v56 = vpop.xlane.xlu1 %1243 }
 0x1e9   :  { %v1707_v20 = vpop.eup %1706  ;;  %1460 = vst [vmem:[#allocation2 + $0xb8] sm:$0xff] %v1396_v44  ;;  %1720 = vrcp.f32 %v1244_v56  ;;  %v2979_v56 = vld [vmem:[#allocation14_spill] sm:$0xff] }
 0x1ea   :  { %v1709_v50 = vpop.eup %1708  ;;  %v1399_v43 = vmul.f32 %v1707_v20, %v2620_v39 }
 0x1eb   :  { %v1398_v0 = vmul.f32 %v1709_v50, %v2624_v7  ;;  %v1250_v42 = vpop.xlane.xlu0 %1249  ;;  %v2980_v50 = vld [vmem:[#allocation16_spill] sm:$0xff] }
 0x1ec   :  { %1463 = vst [vmem:[#allocation2 + $0xd0] sm:$0xff] %v1399_v43  ;;  %1722 = vrcp.f32 %v1250_v42  ;;  %v1248_v33 = vpop.xlane.xlu1 %1247 }
 0x1ed   :  { %v1711_v38 = vpop.eup %1710  ;;  %1462 = vst [vmem:[#allocation2 + $0xc8] sm:$0xff] %v1398_v0  ;;  %1724 = vrcp.f32 %v1248_v33 }
 0x1ee   :  { %v1713_v63 = vpop.eup %1712  ;;  %v1401_v3 = vmul.f32 %v1711_v38, %v2634_v52 }
 0x1ef   :  { %v1400_v48 = vmul.f32 %v1713_v63, %v2636_v8  ;;  %v1254_v5 = vpop.xlane.xlu0 %1253  ;;  %v2974_v8 = vld [vmem:[#allocation10_spill] sm:$0xff] }
 0x1f0   :  { %1465 = vst [vmem:[#allocation2 + $0xe0] sm:$0xff] %v1401_v3  ;;  %1726 = vrcp.f32 %v1254_v5  ;;  %v1252_v10 = vpop.xlane.xlu1 %1251 }
 0x1f1   :  { %v1715_v2 = vpop.eup %1714  ;;  %1464 = vst [vmem:[#allocation2 + $0xd8] sm:$0xff] %v1400_v48  ;;  %1728 = vrcp.f32 %v1252_v10 }
 0x1f2   :  { %v1717_v39 = vpop.eup %1716  ;;  %v1403_v7 = vmul.f32 %v1715_v2, %v2650_v37 }
 0x1f3   :  { %v1402_v12 = vmul.f32 %v1717_v39, %v2648_v18  ;;  %v1258_v35 = vpop.xlane.xlu0 %1257  ;;  %v2981_v39 = vld [vmem:[#allocation17_spill] sm:$0xff] }
 0x1f4   :  { %1467 = vst [vmem:[#allocation2 + $0xf0] sm:$0xff] %v1403_v7  ;;  %1730 = vrcp.f32 %v1258_v35  ;;  %v1256_v6 = vpop.xlane.xlu1 %1255 }
 0x1f5   :  { %v1719_v57 = vpop.eup %1718  ;;  %1466 = vst [vmem:[#allocation2 + $0xe8] sm:$0xff] %v1402_v12  ;;  %1732 = vrcp.f32 %v1256_v6  ;;  %v2982_v12 = vld [vmem:[#allocation15_spill] sm:$0xff] }
 0x1f6   :  { %v1721_v52 = vpop.eup %1720  ;;  %v1405_v11 = vmul.f32 %v1719_v57, %v2974_v8 }
 0x1f7   :  { %v1404_v4 = vmul.f32 %v1721_v52, %v2975_v47  ;;  %v1262_v53 = vpop.xlane.xlu0 %1261 }
 0x1f8   :  { %1469 = vst [vmem:[#allocation2 + $0x100] sm:$0xff] %v1405_v11  ;;  %1734 = vrcp.f32 %v1262_v53  ;;  %v1260_v19 = vpop.xlane.xlu1 %1259  ;;  %v2984_v11 = vld [vmem:[#allocation19_spill] sm:$0xff] }
 0x1f9   :  { %v1723_v32 = vpop.eup %1722  ;;  %1468 = vst [vmem:[#allocation2 + $0xf8] sm:$0xff] %v1404_v4  ;;  %1736 = vrcp.f32 %v1260_v19 }
 0x1fa   :  { %v1725_v18 = vpop.eup %1724  ;;  %v1407_v37 = vmul.f32 %v1723_v32, %v2671_v15 }
 0x1fb   :  { %v1406_v31 = vmul.f32 %v1725_v18, %v2976_v49  ;;  %v1266_v1 = vpop.xlane.xlu0 %1265  ;;  %v2985_v18 = vld [vmem:[#allocation20_spill] sm:$0xff] }
 0x1fc   :  { %1471 = vst [vmem:[#allocation2 + $0x110] sm:$0xff] %v1407_v37  ;;  %1738 = vrcp.f32 %v1266_v1  ;;  %v1264_v23 = vpop.xlane.xlu1 %1263 }
 0x1fd   :  { %v1727_v41 = vpop.eup %1726  ;;  %1470 = vst [vmem:[#allocation2 + $0x108] sm:$0xff] %v1406_v31  ;;  %1740 = vrcp.f32 %v1264_v23 }
 0x1fe   :  { %v1729_v14 = vpop.eup %1728  ;;  %v1409_v62 = vmul.f32 %v1727_v41, %v2977_v29 }
 0x1ff   :  { %v1408_v54 = vmul.f32 %v1729_v14, %v2978_v59  ;;  %v1270_v26 = vpop.xlane.xlu0 %1269 }
 0x200   :  { %1473 = vst [vmem:[#allocation2 + $0x120] sm:$0xff] %v1409_v62  ;;  %1742 = vrcp.f32 %v1270_v26  ;;  %v1268_v44 = vpop.xlane.xlu1 %1267 }
 0x201   :  { %v1731_v46 = vpop.eup %1730  ;;  %1472 = vst [vmem:[#allocation2 + $0x118] sm:$0xff] %v1408_v54  ;;  %1744 = vrcp.f32 %v1268_v44 }
 0x202   :  { %v1733_v15 = vpop.eup %1732  ;;  %v1411_v20 = vmul.f32 %v1731_v46, %v2979_v56 }
 0x203   :  { %v1410_v43 = vmul.f32 %v1733_v15, %v2980_v50  ;;  %v1274_v0 = vpop.xlane.xlu0 %1273 }
 0x204   :  { %1475 = vst [vmem:[#allocation2 + $0x130] sm:$0xff] %v1411_v20  ;;  %1746 = vrcp.f32 %v1274_v0  ;;  %v1272_v42 = vpop.xlane.xlu1 %1271 }
 0x205   :  { %v1735_v33 = vpop.eup %1734  ;;  %1474 = vst [vmem:[#allocation2 + $0x128] sm:$0xff] %v1410_v43  ;;  %1748 = vrcp.f32 %v1272_v42 }
 0x206   :  { %v1737_v38 = vpop.eup %1736  ;;  %v1413_v63 = vmul.f32 %v1735_v33, %v2714_v45 }
 0x207   :  { %v1412_v3 = vmul.f32 %v1737_v38, %v2716_v13  ;;  %v1278_v48 = vpop.xlane.xlu0 %1277  ;;  %v2983_v13 = vld [vmem:[#allocation18_spill] sm:$0xff] }
 0x208   :  { %1477 = vst [vmem:[#allocation2 + $0x140] sm:$0xff] %v1413_v63  ;;  %1750 = vrcp.f32 %v1278_v48  ;;  %v1276_v5 = vpop.xlane.xlu1 %1275 }
 0x209   :  { %v1739_v10 = vpop.eup %1738  ;;  %1476 = vst [vmem:[#allocation2 + $0x138] sm:$0xff] %v1412_v3  ;;  %1752 = vrcp.f32 %v1276_v5 }
 0x20a   :  { %v1741_v2 = vpop.eup %1740  ;;  %v1415_v7 = vmul.f32 %v1739_v10, %v2981_v39 }
 0x20b   :  { %v1414_v35 = vmul.f32 %v1741_v2, %v2982_v12  ;;  %v1282_v6 = vpop.xlane.xlu0 %1281 }
 0x20c   :  { %1479 = vst [vmem:[#allocation2 + $0x150] sm:$0xff] %v1415_v7  ;;  %1754 = vrcp.f32 %v1282_v6  ;;  %v1280_v57 = vpop.xlane.xlu1 %1279 }
 0x20d   :  { %v1743_v52 = vpop.eup %1742  ;;  %1478 = vst [vmem:[#allocation2 + $0x148] sm:$0xff] %v1414_v35  ;;  %1756 = vrcp.f32 %v1280_v57 }
 0x20e   :  { %v1745_v45 = vpop.eup %1744  ;;  %v1417_v8 = vmul.f32 %v1743_v52, %v2983_v13 }
 0x20f   :  { %v1416_v47 = vmul.f32 %v1745_v45, %v2984_v11  ;;  %v1286_v4 = vpop.xlane.xlu0 %1285 }
 0x210   :  { %1481 = vst [vmem:[#allocation2 + $0x160] sm:$0xff] %v1417_v8  ;;  %1758 = vrcp.f32 %v1286_v4  ;;  %v1284_v53 = vpop.xlane.xlu1 %1283 }
 0x211   :  { %v1747_v19 = vpop.eup %1746  ;;  %1480 = vst [vmem:[#allocation2 + $0x158] sm:$0xff] %v1416_v47  ;;  %1760 = vrcp.f32 %v1284_v53 }
 0x212   :  { %v1749_v32 = vpop.eup %1748  ;;  %v1419_v37 = vmul.f32 %v1747_v19, %v2985_v18 }
 0x213   :  { %v1418_v49 = vmul.f32 %v1749_v32, %v2747_v24  ;;  %v1290_v31 = vpop.xlane.xlu0 %1289 }
 0x214   :  { %1483 = vst [vmem:[#allocation2 + $0x170] sm:$0xff] %v1419_v37  ;;  %1762 = vrcp.f32 %v1290_v31  ;;  %v1288_v1 = vpop.xlane.xlu1 %1287 }
 0x215   :  { %v1751_v23 = vpop.eup %1750  ;;  %1482 = vst [vmem:[#allocation2 + $0x168] sm:$0xff] %v1418_v49  ;;  %1764 = vrcp.f32 %v1288_v1 }
 0x216   :  { %v1753_v41 = vpop.eup %1752  ;;  %v1421_v14 = vmul.f32 %v1751_v23, %v2759_v17 }
 0x217   :  { %v1420_v29 = vmul.f32 %v1753_v41, %v2762_v25  ;;  %v1294_v62 = vpop.xlane.xlu0 %1293 }
 0x218   :  { %1485 = vst [vmem:[#allocation2 + $0x180] sm:$0xff] %v1421_v14  ;;  %1766 = vrcp.f32 %v1294_v62  ;;  %v1292_v59 = vpop.xlane.xlu1 %1291 }
 0x219   :  { %v1755_v54 = vpop.eup %1754  ;;  %1484 = vst [vmem:[#allocation2 + $0x178] sm:$0xff] %v1420_v29  ;;  %1768 = vrcp.f32 %v1292_v59 }
 0x21a   :  { %v1757_v24 = vpop.eup %1756  ;;  %v1423_v26 = vmul.f32 %v1755_v54, %v2768_v51 }
 0x21b   :  { %v1422_v44 = vmul.f32 %v1757_v24, %v2770_v55  ;;  %v1298_v46 = vpop.xlane.xlu0 %1297 }
 0x21c   :  { %1487 = vst [vmem:[#allocation2 + $0x190] sm:$0xff] %v1423_v26  ;;  %1770 = vrcp.f32 %v1298_v46  ;;  %v1296_v15 = vpop.xlane.xlu1 %1295 }
 0x21d   :  { %v1759_v56 = vpop.eup %1758  ;;  %1486 = vst [vmem:[#allocation2 + $0x188] sm:$0xff] %v1422_v44  ;;  %1772 = vrcp.f32 %v1296_v15 }
 0x21e   :  { %v1761_v25 = vpop.eup %1760  ;;  %v1425_v17 = vmul.f32 %v1759_v56, %v2774_v27 }
 0x21f   :  { %v1424_v20 = vmul.f32 %v1761_v25, %v2776_v58  ;;  %v1302_v50 = vpop.xlane.xlu0 %1301 }
 0x220   :  { %1489 = vst [vmem:[#allocation2 + $0x1a0] sm:$0xff] %v1425_v17  ;;  %1774 = vrcp.f32 %v1302_v50  ;;  %v1300_v43 = vpop.xlane.xlu1 %1299 }
 0x221   :  { %v1763_v0 = vpop.eup %1762  ;;  %1488 = vst [vmem:[#allocation2 + $0x198] sm:$0xff] %v1424_v20  ;;  %1776 = vrcp.f32 %v1300_v43 }
 0x222   :  { %v1765_v51 = vpop.eup %1764  ;;  %v1427_v55 = vmul.f32 %v1763_v0, %v2782_v21 }
 0x223   :  { %v1426_v42 = vmul.f32 %v1765_v51, %v2779_v34  ;;  %v1306_v33 = vpop.xlane.xlu0 %1305 }
 0x224   :  { %1491 = vst [vmem:[#allocation2 + $0x1b0] sm:$0xff] %v1427_v55  ;;  %1778 = vrcp.f32 %v1306_v33  ;;  %v1304_v38 = vpop.xlane.xlu1 %1303 }
 0x225   :  { %v1767_v63 = vpop.eup %1766  ;;  %1490 = vst [vmem:[#allocation2 + $0x1a8] sm:$0xff] %v1426_v42  ;;  %1780 = vrcp.f32 %v1304_v38 }
 0x226   :  { %v1769_v27 = vpop.eup %1768  ;;  %v1429_v58 = vmul.f32 %v1767_v63, %v2788_v60 }
 0x227   :  { %v1428_v3 = vmul.f32 %v1769_v27, %v2786_v28 }
 0x228   :  { %1493 = vst [vmem:[#allocation2 + $0x1c0] sm:$0xff] %v1429_v58  ;;  %v1308_v48 = vpop.xlane.xlu1 %1307 }
 0x229   :  { %v1771_v5 = vpop.eup %1770  ;;  %1492 = vst [vmem:[#allocation2 + $0x1b8] sm:$0xff] %v1428_v3  ;;  %1782 = vrcp.f32 %v1308_v48 }
 0x22a   :  { %v1773_v21 = vpop.eup %1772  ;;  %v1431_v34 = vmul.f32 %v1771_v5, %v2792_v22 }
 0x22b   :  { %v1430_v10 = vmul.f32 %v1773_v21, %v2794_v61 }
 0x22c   :  { %1495 = vst [vmem:[#allocation2 + $0x1d0] sm:$0xff] %v1431_v34 }
 0x22d   :  { %v1775_v2 = vpop.eup %1774  ;;  %1494 = vst [vmem:[#allocation2 + $0x1c8] sm:$0xff] %v1430_v10 }
 0x22e   :  { %v1777_v39 = vpop.eup %1776  ;;  %v1433_v7 = vmul.f32 %v1775_v2, %v2798_v36 }
 0x22f   :  { %v1432_v60 = vmul.f32 %v1777_v39, %v2800_v30 }
 0x230   :  { %1497 = vst [vmem:[#allocation2 + $0x1e0] sm:$0xff] %v1433_v7 }
 0x231   :  { %v1779_v28 = vpop.eup %1778  ;;  %1496 = vst [vmem:[#allocation2 + $0x1d8] sm:$0xff] %v1432_v60 }
 0x232   :  { %v1781_v12 = vpop.eup %1780  ;;  %v1435_v35 = vmul.f32 %v1779_v28, %v2804_v40 }
 0x233   :  { %v1434_v6 = vmul.f32 %v1781_v12, %v2806_v16 }
 0x234   :  { %1499 = vst [vmem:[#allocation2 + $0x1f0] sm:$0xff] %v1435_v35 }
 0x235   :  { %1498 = vst [vmem:[#allocation2 + $0x1e8] sm:$0xff] %v1434_v6 }
 0x236   :  { %v1783_v22 = vpop.eup %1782 }
 0x237   :  { %v1436_v61 = vmul.f32 %v1783_v22, %v2810_v9 }
 0x239   :  { %1500 = vst [vmem:[#allocation2 + $0x1f8] sm:$0xff] %v1436_v61 }
 0x23a   :  { %1797 = shalt.err (!%p1794_p4)
}
 0x23b   :  { %s1811_s13 = smov 128   ;;  %s1812_s14 = smov 8  }
 0x23c   :  { %1512 = dma.vmem_to_hbm [thread:$0]  %s1507_s2, 8192, %s2883_s3, [#allocation3], %s1811_s13, %s1811_s13, %s1812_s14  }
 0x23d   :  { %1806 = dma.done.wait [#allocation3], 8192  }
 0x23e   :  { %1807 = vsyncadd [#allocation3], 4294959104 }
 0x23f   :  { %1516 = vsyncpa [#allocation3], 1 }

</bundles_post_ra>
